<compile_context>
chip_gen: v7x
topology: tpu7x:2x2x1
jax: 0.10.0
libtpu: 0.0.40
codegen_flags: <defaults>
</compile_context>

<pallas_src>
import functools

import jax
import jax.numpy as jnp
from jax.experimental import pallas as pl
from jax.experimental.pallas import tpu as pltpu

NEG_BIG = -9e15
_VMEM_LIMIT = 48 * 1024 * 1024


# ----------------------------- Pallas kernel ------------------------------- #

def _u_gcn_kernel(x_ref, adj_ref, w_heads_ref, a_heads_ref, w_out_ref, a_out_ref,
                  w1_ref, b1_ref, w2_ref, out_ref, emb_scratch,
                  *, alpha, nheads, nhid):
    """One grid step = full GAT forward for ONE adjacency view.

    Last step additionally performs the AM-GCN view attention over
    {scratch (view 0), fresh value (view 1)} and writes the fused output.
    """
    v = pl.program_id(0)
    last = pl.num_programs(0) - 1

    x = x_ref[...]                                   # (N, Fin) bf16
    # Edge mask, computed once per view, reused by every head + out layer.
    # NOTE: a fully-masked row degenerates to uniform weights (same as torch
    # with no self-loop) -- inputs here always carry self-loops.
    mask = adj_ref[0] != 0                           # (N, N) bool

    def attend(Wh_bf, f1_col, f2_row):
        # e[i,j] = LeakyReLU(f1[i] + f2[j]); mask; softmax over j; (p @ Wh) * inv
        e = f1_col + f2_row                          # (N, N) f32
        e = jnp.where(e > 0, e, alpha * e)           # LeakyReLU
        e = jnp.where(mask, e, NEG_BIG)              # mask per use, no bias tensor
        e = e - jnp.max(e, axis=1, keepdims=True)
        p = jnp.exp(e)
        inv = pl.reciprocal(jnp.sum(p, axis=1, keepdims=True), approx=True)
        # Normalize AFTER the MXU matmul; bf16 MXU operands, f32 accumulate.
        return jnp.dot(p.astype(jnp.bfloat16), Wh_bf,
                       preferred_element_type=jnp.float32) * inv

    def elu(t):
        # exp(min(t,0)) keeps the discarded branch finite.
        return jnp.where(t > 0, t, jnp.exp(jnp.minimum(t, 0.0)) - 1.0)

    # ---- multi-head layer: all heads batched into two matmuls ------------- #
    Wh_all = jnp.dot(x, w_heads_ref[0],
                     preferred_element_type=jnp.float32)          # (N, nheads*nhid) f32
    Wh_all_bf = Wh_all.astype(jnp.bfloat16)
    F12 = jnp.dot(Wh_all_bf, a_heads_ref[0],
                  preferred_element_type=jnp.float32)             # (N, 2*nheads) f32
    F12_T = F12.T                                                 # single hoisted transpose

    head_outs = []
    for h in range(nheads):
        Wh_h = Wh_all_bf[:, h * nhid:(h + 1) * nhid]              # (N, nhid) bf16
        f1 = F12[:, 2 * h:2 * h + 1]                              # (N, 1)
        f2 = F12_T[2 * h + 1:2 * h + 2, :]                        # (1, N) sublane slice
        head_outs.append(elu(attend(Wh_h, f1, f2)))
    # Lane-axis concat of small per-head tiles (VMEM-resident, no HBM trip).
    h1 = jnp.concatenate(head_outs, axis=1).astype(jnp.bfloat16)  # (N, nheads*nhid)

    # ---- output GAT layer (single head + ELU) ------------------------------ #
    Wh2 = jnp.dot(h1, w_out_ref[0], preferred_element_type=jnp.float32)     # (N, nclass)
    Wh2_bf = Wh2.astype(jnp.bfloat16)
    f12 = jnp.dot(Wh2_bf, a_out_ref[0], preferred_element_type=jnp.float32) # (N, 2)
    f12_T = f12.T
    emb_v = elu(attend(Wh2_bf, f12[:, 0:1], f12_T[1:2, :]))                 # (N, nclass) f32

    @pl.when(v < last)
    def _():
        emb_scratch[...] = emb_v

    # ---- view-attention fusion, fused into the last grid step -------------- #
    @pl.when(v == last)
    def _():
        z1 = emb_scratch[...]                        # view 0 embedding
        z2 = emb_v                                   # view 1 embedding (fresh)
        w1 = w1_ref[...]
        b1 = b1_ref[...]
        w2 = w2_ref[...]
        p1 = jnp.tanh(jnp.dot(z1.astype(jnp.bfloat16), w1,
                              preferred_element_type=jnp.float32) + b1)
        p2 = jnp.tanh(jnp.dot(z2.astype(jnp.bfloat16), w1,
                              preferred_element_type=jnp.float32) + b1)
        s1 = jnp.dot(p1.astype(jnp.bfloat16), w2,
                     preferred_element_type=jnp.float32)           # (N, 1)
        s2 = jnp.dot(p2.astype(jnp.bfloat16), w2,
                     preferred_element_type=jnp.float32)           # (N, 1)
        m = jnp.maximum(s1, s2)
        x1 = jnp.exp(s1 - m)
        x2 = jnp.exp(s2 - m)
        inv = pl.reciprocal(x1 + x2, approx=True)
        # beta * z summed over the view axis (== emb.sum(1) in the PyTorch code)
        out_ref[...] = (x1 * inv) * z1 + (x2 * inv) * z2


# ----------------------------- wrapper -------------------------------------- #

def u_gcn_forward(packed, feature, adj, *, alpha, nheads, nhid, nclass):
    """Single pallas_call: both GAT views + view-attention fusion."""
    N, Fin = feature.shape
    HH = nheads * nhid
    hp = packed["w1"].shape[1]

    x_bf = feature.astype(jnp.bfloat16)
    if adj.dtype != jnp.int8:
        adj = (adj != 0).astype(jnp.int8)

    kern = functools.partial(_u_gcn_kernel, alpha=alpha, nheads=nheads, nhid=nhid)
    return pl.pallas_call(
        kern,
        out_shape=jax.ShapeDtypeStruct((N, nclass), jnp.float32),
        grid=(2,),
        in_specs=[
            pl.BlockSpec((N, Fin), lambda v: (0, 0)),               # shared features (bf16)
            pl.BlockSpec((1, N, N), lambda v: (v, 0, 0)),           # per-view adjacency (int8)
            pl.BlockSpec((1, Fin, HH), lambda v: (v, 0, 0)),        # packed head W (bf16)
            pl.BlockSpec((1, HH, 2 * nheads), lambda v: (v, 0, 0)),  # packed head a1/a2 (bf16)
            pl.BlockSpec((1, HH, nclass), lambda v: (v, 0, 0)),     # out-layer W (bf16)
            pl.BlockSpec((1, nclass, 2), lambda v: (v, 0, 0)),      # out-layer [a1|a2] (bf16)
            pl.BlockSpec((nclass, hp), lambda v: (0, 0)),           # attention W1 (bf16, shared)
            pl.BlockSpec((1, hp), lambda v: (0, 0)),                # attention b1 (f32, shared)
            pl.BlockSpec((hp, 1), lambda v: (0, 0)),                # attention W2 (bf16, shared)
        ],
        out_specs=pl.BlockSpec((N, nclass), lambda v: (0, 0)),
        scratch_shapes=[pltpu.VMEM((N, nclass), jnp.float32)],      # view-0 embedding
        compiler_params=pltpu.CompilerParams(
            # View axis is serial ("arbitrary"): the fused epilogue on the last
            # step depends on the previous step's scratch.
            dimension_semantics=("arbitrary",),
            vmem_limit_bytes=_VMEM_LIMIT,
        ),
    )(x_bf, adj, packed["w_heads"], packed["a_heads"], packed["w_out"],
      packed["a_out"], packed["w1"], packed["b1"], packed["w2"])


# ----------------------------- param packing (one-time) --------------------- #

def _pack_gat_params(gat):
    heads = gat["heads"]
    nheads = len(heads)
    nhid = heads[0]["W"].shape[1]
    # All heads' W side-by-side -> single (Fin, nheads*nhid) matmul for Wh.
    w_heads = jnp.concatenate([h["W"] for h in heads], axis=1)
    # Block-structured a: head h's a1 -> column 2h, a2 -> column 2h+1,
    # occupying rows [h*nhid, (h+1)*nhid).  One matmul gives every head's f1/f2.
    a_heads = jnp.zeros((nheads * nhid, 2 * nheads), jnp.float32)
    for h, hd in enumerate(heads):
        a_heads = a_heads.at[h * nhid:(h + 1) * nhid, 2 * h].set(hd["a1"][:, 0])
        a_heads = a_heads.at[h * nhid:(h + 1) * nhid, 2 * h + 1].set(hd["a2"][:, 0])
    w_out = gat["out"]["W"]
    a_out = jnp.concatenate([gat["out"]["a1"], gat["out"]["a2"]], axis=1)   # (nclass, 2)
    return w_heads, a_heads, w_out, a_out


def pack_u_gcn_params(params):
    """One-time packing + bf16 cast of all weights.  Do NOT call per forward."""
    p1 = _pack_gat_params(params["SGAT1"])
    p2 = _pack_gat_params(params["SGAT2"])
    bf = jnp.bfloat16
    att = params["attention"]
    return {
        "w_heads": jnp.stack([p1[0], p2[0]]).astype(bf),   # (2, Fin, nheads*nhid)
        "a_heads": jnp.stack([p1[1], p2[1]]).astype(bf),   # (2, nheads*nhid, 2*nheads)
        "w_out": jnp.stack([p1[2], p2[2]]).astype(bf),     # (2, nheads*nhid, nclass)
        "a_out": jnp.stack([p1[3], p2[3]]).astype(bf),     # (2, nclass, 2)
        "w1": att["w1"].astype(bf),                        # (nclass, hidden)
        "b1": att["b1"].astype(jnp.float32),               # (1, hidden)
        "w2": att["w2"].astype(bf),                        # (hidden, 1)
    }


# ----------------------------- param init ----------------------------------- #

def _xavier_uniform(key, shape, gain=1.414):
    fan_in, fan_out = shape
    bound = gain * (6.0 / (fan_in + fan_out)) ** 0.5
    return jax.random.uniform(key, shape, jnp.float32, -bound, bound)


def init_gat_params(key, input_dim, nhid, nclass, nheads):
    keys = jax.random.split(key, 2 * nheads + 2)
    heads = []
    for i in range(nheads):
        W = _xavier_uniform(keys[2 * i], (input_dim, nhid))
        a = _xavier_uniform(keys[2 * i + 1], (2 * nhid, 1))
        heads.append({"W": W, "a1": a[:nhid], "a2": a[nhid:]})
    W = _xavier_uniform(keys[-2], (nhid * nheads, nclass))
    a = _xavier_uniform(keys[-1], (2 * nclass, 1))
    return {"heads": heads, "out": {"W": W, "a1": a[:nclass], "a2": a[nclass:]}}


def init_attention_params(key, in_size, hidden_size=16):
    k1, k2, k3 = jax.random.split(key, 3)
    w1 = _xavier_uniform(k1, (in_size, hidden_size), gain=1.0)
    b1 = 0.01 * jax.random.normal(k2, (1, hidden_size), jnp.float32)
    w2 = _xavier_uniform(k3, (hidden_size, 1), gain=1.0)
    return {"w1": w1, "b1": b1, "w2": w2}


def init_u_gcn_params(key, cfg):
    k1, k2, k3 = jax.random.split(key, 3)
    return {
        "SGAT1": init_gat_params(k1, cfg["input_dim"], cfg["out_features"],
                                 cfg["final_features"], cfg["nheads"]),
        "SGAT2": init_gat_params(k2, cfg["input_dim"], cfg["out_features"],
                                 cfg["final_features"], cfg["nheads"]),
        "attention": init_attention_params(k3, cfg["final_features"]),
    }


# ----------------------------- main ----------------------------------------- #

if __name__ == "__main__":
    cfg = {
        "input_dim": 8,
        "out_features": 8,       # nhid per head
        "final_features": 16,    # nclass / embedding dim
        "dropout": 0.0,          # eval mode: dropout is identity
        "alpha": 0.2,
        "nheads": 4,
    }
    N = 16  # number of graph nodes

    key = jax.random.PRNGKey(0)
    k_param, k_feat, k_adj = jax.random.split(key, 3)

    params = init_u_gcn_params(k_param, cfg)
    packed = pack_u_gcn_params(params)   # one-time packing, outside forward path

    feature = jax.random.normal(k_feat, (N, cfg["input_dim"]), jnp.float32)

    # two adjacency views, binary with self-loops, stored as int8
    raw = jax.random.uniform(k_adj, (2, N, N))
    eye = jnp.eye(N, dtype=bool)[None]
    adj = ((raw > 0.5) | eye).astype(jnp.int8)

    out = u_gcn_forward(packed, feature, adj, alpha=cfg["alpha"],
                        nheads=cfg["nheads"], nhid=cfg["out_features"],
                        nclass=cfg["final_features"])
    out = jax.block_until_ready(out)
    assert out.shape == (N, cfg["final_features"])
    assert bool(jnp.all(jnp.isfinite(out)))
    print("KERNEL_OK")
</pallas_src>

<mosaic_0001>
module attributes {stable_mosaic.version = 11 : i64} {
  func.func @_u_gcn_kernel(%arg0: i32, %arg1: memref<16x8xbf16, #tpu.memory_space<vmem>>, %arg2: memref<1x16x16xi8, #tpu.memory_space<vmem>>, %arg3: memref<1x8x32xbf16, #tpu.memory_space<vmem>>, %arg4: memref<1x32x8xbf16, #tpu.memory_space<vmem>>, %arg5: memref<1x32x16xbf16, #tpu.memory_space<vmem>>, %arg6: memref<1x16x2xbf16, #tpu.memory_space<vmem>>, %arg7: memref<16x16xbf16, #tpu.memory_space<vmem>>, %arg8: memref<1x16xf32, #tpu.memory_space<vmem>>, %arg9: memref<16x1xbf16, #tpu.memory_space<vmem>>, %arg10: memref<16x16xf32, #tpu.memory_space<vmem>>, %arg11: memref<16x16xf32, #tpu.memory_space<vmem>>) attributes {dimension_semantics = [#tpu.dimension_semantics<arbitrary>], iteration_bounds = array<i64: 2>, scalar_prefetch = 0 : i64, scratch_operands = 1 : i64, tpu.core_type = #tpu.core_type<tc>, window_params = [{pipeline_mode = #tpu.pipeline_mode<synchronous>, transform_indices = @transform_0, window_bounds = array<i64: 16, 8>}, {transform_indices = @transform_1, window_bounds = array<i64: 1, 16, 16>}, {transform_indices = @transform_2, window_bounds = array<i64: 1, 8, 32>}, {transform_indices = @transform_3, window_bounds = array<i64: 1, 32, 8>}, {transform_indices = @transform_4, window_bounds = array<i64: 1, 32, 16>}, {transform_indices = @transform_5, window_bounds = array<i64: 1, 16, 2>}, {pipeline_mode = #tpu.pipeline_mode<synchronous>, transform_indices = @transform_6, window_bounds = array<i64: 16, 16>}, {pipeline_mode = #tpu.pipeline_mode<synchronous>, transform_indices = @transform_7, window_bounds = array<i64: 1, 16>}, {pipeline_mode = #tpu.pipeline_mode<synchronous>, transform_indices = @transform_8, window_bounds = array<i64: 16, 1>}, {pipeline_mode = #tpu.pipeline_mode<synchronous>, transform_indices = @transform_9, window_bounds = array<i64: 16, 16>}]} {
    %c0 = arith.constant 0 : index
    %c0_0 = arith.constant 0 : index
    %0 = vector.load %arg1[%c0, %c0_0] : memref<16x8xbf16, #tpu.memory_space<vmem>>, vector<16x8xbf16>
    %c0_1 = arith.constant 0 : index
    %c0_2 = arith.constant 0 : index
    %c0_3 = arith.constant 0 : index
    %1 = vector.load %arg2[%c0_1, %c0_2, %c0_3] : memref<1x16x16xi8, #tpu.memory_space<vmem>>, vector<1x16x16xi8>
    %2 = vector.shape_cast %1 : vector<1x16x16xi8> to vector<16x16xi8>
    %c0_i8 = arith.constant 0 : i8
    %3 = vector.broadcast %c0_i8 : i8 to vector<16x16xi8>
    %4 = arith.cmpi ne, %2, %3 : vector<16x16xi8>
    %c0_4 = arith.constant 0 : index
    %c0_5 = arith.constant 0 : index
    %c0_6 = arith.constant 0 : index
    %5 = vector.load %arg3[%c0_4, %c0_5, %c0_6] : memref<1x8x32xbf16, #tpu.memory_space<vmem>>, vector<1x8x32xbf16>
    %6 = vector.shape_cast %5 : vector<1x8x32xbf16> to vector<8x32xbf16>
    %cst = arith.constant dense<0.000000e+00> : vector<16x32xf32>
    %7 = tpu.matmul %0, %6, %cst {dimension_numbers = #tpu.dot_dimension_numbers<[1], [0], [0], [1], [0, 0, 1, 1], [], []>} : vector<16x8xbf16>, vector<8x32xbf16>, vector<16x32xf32> -> vector<16x32xf32>
    %8 = arith.truncf %7 : vector<16x32xf32> to vector<16x32xbf16>
    %c0_7 = arith.constant 0 : index
    %c0_8 = arith.constant 0 : index
    %c0_9 = arith.constant 0 : index
    %9 = vector.load %arg4[%c0_7, %c0_8, %c0_9] : memref<1x32x8xbf16, #tpu.memory_space<vmem>>, vector<1x32x8xbf16>
    %10 = vector.shape_cast %9 : vector<1x32x8xbf16> to vector<32x8xbf16>
    %cst_10 = arith.constant dense<0.000000e+00> : vector<16x8xf32>
    %11 = tpu.matmul %8, %10, %cst_10 {dimension_numbers = #tpu.dot_dimension_numbers<[1], [0], [0], [1], [0, 0, 1, 1], [], []>} : vector<16x32xbf16>, vector<32x8xbf16>, vector<16x8xf32> -> vector<16x8xf32>
    %12 = tpu.transpose %11, [1, 0] : vector<16x8xf32> -> vector<8x16xf32>
    %13 = vector.extract_strided_slice %8 {offsets = [0, 0], sizes = [16, 8], strides = [1, 1]} : vector<16x32xbf16> to vector<16x8xbf16>
    %14 = vector.extract_strided_slice %11 {offsets = [0, 0], sizes = [16, 1], strides = [1, 1]} : vector<16x8xf32> to vector<16x1xf32>
    %15 = vector.extract_strided_slice %12 {offsets = [1, 0], sizes = [1, 16], strides = [1, 1]} : vector<8x16xf32> to vector<1x16xf32>
    %16 = vector.broadcast %14 : vector<16x1xf32> to vector<16x16xf32>
    %17 = vector.broadcast %15 : vector<1x16xf32> to vector<16x16xf32>
    %18 = arith.addf %16, %17 : vector<16x16xf32>
    %cst_11 = arith.constant 0.000000e+00 : f32
    %19 = vector.broadcast %cst_11 : f32 to vector<16x16xf32>
    %20 = arith.cmpf ogt, %18, %19 : vector<16x16xf32>
    %cst_12 = arith.constant 2.000000e-01 : f32
    %21 = vector.broadcast %cst_12 : f32 to vector<16x16xf32>
    %22 = arith.mulf %21, %18 : vector<16x16xf32>
    %23 = arith.select %20, %18, %22 : vector<16x16xi1>, vector<16x16xf32>
    %cst_13 = arith.constant -9.000000e+15 : f32
    %24 = vector.broadcast %cst_13 : f32 to vector<16x16xf32>
    %25 = arith.select %4, %23, %24 : vector<16x16xi1>, vector<16x16xf32>
    %cst_14 = arith.constant dense<0xFF800000> : vector<16xf32>
    %26 = vector.multi_reduction <maximumf>, %25, %cst_14 [1] : vector<16x16xf32> to vector<16xf32>
    %27 = vector.shape_cast %26 : vector<16xf32> to vector<16x1xf32>
    %28 = vector.broadcast %27 : vector<16x1xf32> to vector<16x16xf32>
    %29 = arith.subf %25, %28 : vector<16x16xf32>
    %30 = math.exp %29 : vector<16x16xf32>
    %cst_15 = arith.constant dense<0.000000e+00> : vector<16xf32>
    %31 = vector.multi_reduction <add>, %30, %cst_15 [1] : vector<16x16xf32> to vector<16xf32>
    %32 = vector.shape_cast %31 : vector<16xf32> to vector<16x1xf32>
    %33 = tpu.reciprocal %32 {approx = true} : vector<16x1xf32> -> vector<16x1xf32>
    %34 = arith.truncf %30 : vector<16x16xf32> to vector<16x16xbf16>
    %cst_16 = arith.constant dense<0.000000e+00> : vector<16x8xf32>
    %35 = tpu.matmul %34, %13, %cst_16 {dimension_numbers = #tpu.dot_dimension_numbers<[1], [0], [0], [1], [0, 0, 1, 1], [], []>} : vector<16x16xbf16>, vector<16x8xbf16>, vector<16x8xf32> -> vector<16x8xf32>
    %36 = vector.broadcast %33 : vector<16x1xf32> to vector<16x8xf32>
    %37 = arith.mulf %35, %36 : vector<16x8xf32>
    %cst_17 = arith.constant 0.000000e+00 : f32
    %38 = vector.broadcast %cst_17 : f32 to vector<16x8xf32>
    %39 = arith.cmpf ogt, %37, %38 : vector<16x8xf32>
    %cst_18 = arith.constant 0.000000e+00 : f32
    %40 = vector.broadcast %cst_18 : f32 to vector<16x8xf32>
    %41 = arith.minimumf %37, %40 : vector<16x8xf32>
    %42 = math.exp %41 : vector<16x8xf32>
    %cst_19 = arith.constant 1.000000e+00 : f32
    %43 = vector.broadcast %cst_19 : f32 to vector<16x8xf32>
    %44 = arith.subf %42, %43 : vector<16x8xf32>
    %45 = arith.select %39, %37, %44 : vector<16x8xi1>, vector<16x8xf32>
    %46 = vector.extract_strided_slice %8 {offsets = [0, 8], sizes = [16, 8], strides = [1, 1]} : vector<16x32xbf16> to vector<16x8xbf16>
    %47 = vector.extract_strided_slice %11 {offsets = [0, 2], sizes = [16, 1], strides = [1, 1]} : vector<16x8xf32> to vector<16x1xf32>
    %48 = vector.extract_strided_slice %12 {offsets = [3, 0], sizes = [1, 16], strides = [1, 1]} : vector<8x16xf32> to vector<1x16xf32>
    %49 = vector.broadcast %47 : vector<16x1xf32> to vector<16x16xf32>
    %50 = vector.broadcast %48 : vector<1x16xf32> to vector<16x16xf32>
    %51 = arith.addf %49, %50 : vector<16x16xf32>
    %cst_20 = arith.constant 0.000000e+00 : f32
    %52 = vector.broadcast %cst_20 : f32 to vector<16x16xf32>
    %53 = arith.cmpf ogt, %51, %52 : vector<16x16xf32>
    %cst_21 = arith.constant 2.000000e-01 : f32
    %54 = vector.broadcast %cst_21 : f32 to vector<16x16xf32>
    %55 = arith.mulf %54, %51 : vector<16x16xf32>
    %56 = arith.select %53, %51, %55 : vector<16x16xi1>, vector<16x16xf32>
    %cst_22 = arith.constant -9.000000e+15 : f32
    %57 = vector.broadcast %cst_22 : f32 to vector<16x16xf32>
    %58 = arith.select %4, %56, %57 : vector<16x16xi1>, vector<16x16xf32>
    %cst_23 = arith.constant dense<0xFF800000> : vector<16xf32>
    %59 = vector.multi_reduction <maximumf>, %58, %cst_23 [1] : vector<16x16xf32> to vector<16xf32>
    %60 = vector.shape_cast %59 : vector<16xf32> to vector<16x1xf32>
    %61 = vector.broadcast %60 : vector<16x1xf32> to vector<16x16xf32>
    %62 = arith.subf %58, %61 : vector<16x16xf32>
    %63 = math.exp %62 : vector<16x16xf32>
    %cst_24 = arith.constant dense<0.000000e+00> : vector<16xf32>
    %64 = vector.multi_reduction <add>, %63, %cst_24 [1] : vector<16x16xf32> to vector<16xf32>
    %65 = vector.shape_cast %64 : vector<16xf32> to vector<16x1xf32>
    %66 = tpu.reciprocal %65 {approx = true} : vector<16x1xf32> -> vector<16x1xf32>
    %67 = arith.truncf %63 : vector<16x16xf32> to vector<16x16xbf16>
    %cst_25 = arith.constant dense<0.000000e+00> : vector<16x8xf32>
    %68 = tpu.matmul %67, %46, %cst_25 {dimension_numbers = #tpu.dot_dimension_numbers<[1], [0], [0], [1], [0, 0, 1, 1], [], []>} : vector<16x16xbf16>, vector<16x8xbf16>, vector<16x8xf32> -> vector<16x8xf32>
    %69 = vector.broadcast %66 : vector<16x1xf32> to vector<16x8xf32>
    %70 = arith.mulf %68, %69 : vector<16x8xf32>
    %cst_26 = arith.constant 0.000000e+00 : f32
    %71 = vector.broadcast %cst_26 : f32 to vector<16x8xf32>
    %72 = arith.cmpf ogt, %70, %71 : vector<16x8xf32>
    %cst_27 = arith.constant 0.000000e+00 : f32
    %73 = vector.broadcast %cst_27 : f32 to vector<16x8xf32>
    %74 = arith.minimumf %70, %73 : vector<16x8xf32>
    %75 = math.exp %74 : vector<16x8xf32>
    %cst_28 = arith.constant 1.000000e+00 : f32
    %76 = vector.broadcast %cst_28 : f32 to vector<16x8xf32>
    %77 = arith.subf %75, %76 : vector<16x8xf32>
    %78 = arith.select %72, %70, %77 : vector<16x8xi1>, vector<16x8xf32>
    %79 = vector.extract_strided_slice %8 {offsets = [0, 16], sizes = [16, 8], strides = [1, 1]} : vector<16x32xbf16> to vector<16x8xbf16>
    %80 = vector.extract_strided_slice %11 {offsets = [0, 4], sizes = [16, 1], strides = [1, 1]} : vector<16x8xf32> to vector<16x1xf32>
    %81 = vector.extract_strided_slice %12 {offsets = [5, 0], sizes = [1, 16], strides = [1, 1]} : vector<8x16xf32> to vector<1x16xf32>
    %82 = vector.broadcast %80 : vector<16x1xf32> to vector<16x16xf32>
    %83 = vector.broadcast %81 : vector<1x16xf32> to vector<16x16xf32>
    %84 = arith.addf %82, %83 : vector<16x16xf32>
    %cst_29 = arith.constant 0.000000e+00 : f32
    %85 = vector.broadcast %cst_29 : f32 to vector<16x16xf32>
    %86 = arith.cmpf ogt, %84, %85 : vector<16x16xf32>
    %cst_30 = arith.constant 2.000000e-01 : f32
    %87 = vector.broadcast %cst_30 : f32 to vector<16x16xf32>
    %88 = arith.mulf %87, %84 : vector<16x16xf32>
    %89 = arith.select %86, %84, %88 : vector<16x16xi1>, vector<16x16xf32>
    %cst_31 = arith.constant -9.000000e+15 : f32
    %90 = vector.broadcast %cst_31 : f32 to vector<16x16xf32>
    %91 = arith.select %4, %89, %90 : vector<16x16xi1>, vector<16x16xf32>
    %cst_32 = arith.constant dense<0xFF800000> : vector<16xf32>
    %92 = vector.multi_reduction <maximumf>, %91, %cst_32 [1] : vector<16x16xf32> to vector<16xf32>
    %93 = vector.shape_cast %92 : vector<16xf32> to vector<16x1xf32>
    %94 = vector.broadcast %93 : vector<16x1xf32> to vector<16x16xf32>
    %95 = arith.subf %91, %94 : vector<16x16xf32>
    %96 = math.exp %95 : vector<16x16xf32>
    %cst_33 = arith.constant dense<0.000000e+00> : vector<16xf32>
    %97 = vector.multi_reduction <add>, %96, %cst_33 [1] : vector<16x16xf32> to vector<16xf32>
    %98 = vector.shape_cast %97 : vector<16xf32> to vector<16x1xf32>
    %99 = tpu.reciprocal %98 {approx = true} : vector<16x1xf32> -> vector<16x1xf32>
    %100 = arith.truncf %96 : vector<16x16xf32> to vector<16x16xbf16>
    %cst_34 = arith.constant dense<0.000000e+00> : vector<16x8xf32>
    %101 = tpu.matmul %100, %79, %cst_34 {dimension_numbers = #tpu.dot_dimension_numbers<[1], [0], [0], [1], [0, 0, 1, 1], [], []>} : vector<16x16xbf16>, vector<16x8xbf16>, vector<16x8xf32> -> vector<16x8xf32>
    %102 = vector.broadcast %99 : vector<16x1xf32> to vector<16x8xf32>
    %103 = arith.mulf %101, %102 : vector<16x8xf32>
    %cst_35 = arith.constant 0.000000e+00 : f32
    %104 = vector.broadcast %cst_35 : f32 to vector<16x8xf32>
    %105 = arith.cmpf ogt, %103, %104 : vector<16x8xf32>
    %cst_36 = arith.constant 0.000000e+00 : f32
    %106 = vector.broadcast %cst_36 : f32 to vector<16x8xf32>
    %107 = arith.minimumf %103, %106 : vector<16x8xf32>
    %108 = math.exp %107 : vector<16x8xf32>
    %cst_37 = arith.constant 1.000000e+00 : f32
    %109 = vector.broadcast %cst_37 : f32 to vector<16x8xf32>
    %110 = arith.subf %108, %109 : vector<16x8xf32>
    %111 = arith.select %105, %103, %110 : vector<16x8xi1>, vector<16x8xf32>
    %112 = vector.extract_strided_slice %8 {offsets = [0, 24], sizes = [16, 8], strides = [1, 1]} : vector<16x32xbf16> to vector<16x8xbf16>
    %113 = vector.extract_strided_slice %11 {offsets = [0, 6], sizes = [16, 1], strides = [1, 1]} : vector<16x8xf32> to vector<16x1xf32>
    %114 = vector.extract_strided_slice %12 {offsets = [7, 0], sizes = [1, 16], strides = [1, 1]} : vector<8x16xf32> to vector<1x16xf32>
    %115 = vector.broadcast %113 : vector<16x1xf32> to vector<16x16xf32>
    %116 = vector.broadcast %114 : vector<1x16xf32> to vector<16x16xf32>
    %117 = arith.addf %115, %116 : vector<16x16xf32>
    %cst_38 = arith.constant 0.000000e+00 : f32
    %118 = vector.broadcast %cst_38 : f32 to vector<16x16xf32>
    %119 = arith.cmpf ogt, %117, %118 : vector<16x16xf32>
    %cst_39 = arith.constant 2.000000e-01 : f32
    %120 = vector.broadcast %cst_39 : f32 to vector<16x16xf32>
    %121 = arith.mulf %120, %117 : vector<16x16xf32>
    %122 = arith.select %119, %117, %121 : vector<16x16xi1>, vector<16x16xf32>
    %cst_40 = arith.constant -9.000000e+15 : f32
    %123 = vector.broadcast %cst_40 : f32 to vector<16x16xf32>
    %124 = arith.select %4, %122, %123 : vector<16x16xi1>, vector<16x16xf32>
    %cst_41 = arith.constant dense<0xFF800000> : vector<16xf32>
    %125 = vector.multi_reduction <maximumf>, %124, %cst_41 [1] : vector<16x16xf32> to vector<16xf32>
    %126 = vector.shape_cast %125 : vector<16xf32> to vector<16x1xf32>
    %127 = vector.broadcast %126 : vector<16x1xf32> to vector<16x16xf32>
    %128 = arith.subf %124, %127 : vector<16x16xf32>
    %129 = math.exp %128 : vector<16x16xf32>
    %cst_42 = arith.constant dense<0.000000e+00> : vector<16xf32>
    %130 = vector.multi_reduction <add>, %129, %cst_42 [1] : vector<16x16xf32> to vector<16xf32>
    %131 = vector.shape_cast %130 : vector<16xf32> to vector<16x1xf32>
    %132 = tpu.reciprocal %131 {approx = true} : vector<16x1xf32> -> vector<16x1xf32>
    %133 = arith.truncf %129 : vector<16x16xf32> to vector<16x16xbf16>
    %cst_43 = arith.constant dense<0.000000e+00> : vector<16x8xf32>
    %134 = tpu.matmul %133, %112, %cst_43 {dimension_numbers = #tpu.dot_dimension_numbers<[1], [0], [0], [1], [0, 0, 1, 1], [], []>} : vector<16x16xbf16>, vector<16x8xbf16>, vector<16x8xf32> -> vector<16x8xf32>
    %135 = vector.broadcast %132 : vector<16x1xf32> to vector<16x8xf32>
    %136 = arith.mulf %134, %135 : vector<16x8xf32>
    %cst_44 = arith.constant 0.000000e+00 : f32
    %137 = vector.broadcast %cst_44 : f32 to vector<16x8xf32>
    %138 = arith.cmpf ogt, %136, %137 : vector<16x8xf32>
    %cst_45 = arith.constant 0.000000e+00 : f32
    %139 = vector.broadcast %cst_45 : f32 to vector<16x8xf32>
    %140 = arith.minimumf %136, %139 : vector<16x8xf32>
    %141 = math.exp %140 : vector<16x8xf32>
    %cst_46 = arith.constant 1.000000e+00 : f32
    %142 = vector.broadcast %cst_46 : f32 to vector<16x8xf32>
    %143 = arith.subf %141, %142 : vector<16x8xf32>
    %144 = arith.select %138, %136, %143 : vector<16x8xi1>, vector<16x8xf32>
    %145 = tpu.concatenate %45, %78, %111, %144 in 1 : vector<16x8xf32>, vector<16x8xf32>, vector<16x8xf32>, vector<16x8xf32> -> vector<16x32xf32>
    %146 = arith.truncf %145 : vector<16x32xf32> to vector<16x32xbf16>
    %c0_47 = arith.constant 0 : index
    %c0_48 = arith.constant 0 : index
    %c0_49 = arith.constant 0 : index
    %147 = vector.load %arg5[%c0_47, %c0_48, %c0_49] : memref<1x32x16xbf16, #tpu.memory_space<vmem>>, vector<1x32x16xbf16>
    %148 = vector.shape_cast %147 : vector<1x32x16xbf16> to vector<32x16xbf16>
    %cst_50 = arith.constant dense<0.000000e+00> : vector<16x16xf32>
    %149 = tpu.matmul %146, %148, %cst_50 {dimension_numbers = #tpu.dot_dimension_numbers<[1], [0], [0], [1], [0, 0, 1, 1], [], []>} : vector<16x32xbf16>, vector<32x16xbf16>, vector<16x16xf32> -> vector<16x16xf32>
    %150 = arith.truncf %149 : vector<16x16xf32> to vector<16x16xbf16>
    %c0_51 = arith.constant 0 : index
    %c0_52 = arith.constant 0 : index
    %c0_53 = arith.constant 0 : index
    %151 = vector.load %arg6[%c0_51, %c0_52, %c0_53] : memref<1x16x2xbf16, #tpu.memory_space<vmem>>, vector<1x16x2xbf16>
    %152 = vector.shape_cast %151 : vector<1x16x2xbf16> to vector<16x2xbf16>
    %cst_54 = arith.constant dense<0.000000e+00> : vector<16x2xf32>
    %153 = tpu.matmul %150, %152, %cst_54 {dimension_numbers = #tpu.dot_dimension_numbers<[1], [0], [0], [1], [0, 0, 1, 1], [], []>} : vector<16x16xbf16>, vector<16x2xbf16>, vector<16x2xf32> -> vector<16x2xf32>
    %154 = tpu.transpose %153, [1, 0] : vector<16x2xf32> -> vector<2x16xf32>
    %155 = vector.extract_strided_slice %153 {offsets = [0, 0], sizes = [16, 1], strides = [1, 1]} : vector<16x2xf32> to vector<16x1xf32>
    %156 = vector.extract_strided_slice %154 {offsets = [1, 0], sizes = [1, 16], strides = [1, 1]} : vector<2x16xf32> to vector<1x16xf32>
    %157 = vector.broadcast %155 : vector<16x1xf32> to vector<16x16xf32>
    %158 = vector.broadcast %156 : vector<1x16xf32> to vector<16x16xf32>
    %159 = arith.addf %157, %158 : vector<16x16xf32>
    %cst_55 = arith.constant 0.000000e+00 : f32
    %160 = vector.broadcast %cst_55 : f32 to vector<16x16xf32>
    %161 = arith.cmpf ogt, %159, %160 : vector<16x16xf32>
    %cst_56 = arith.constant 2.000000e-01 : f32
    %162 = vector.broadcast %cst_56 : f32 to vector<16x16xf32>
    %163 = arith.mulf %162, %159 : vector<16x16xf32>
    %164 = arith.select %161, %159, %163 : vector<16x16xi1>, vector<16x16xf32>
    %cst_57 = arith.constant -9.000000e+15 : f32
    %165 = vector.broadcast %cst_57 : f32 to vector<16x16xf32>
    %166 = arith.select %4, %164, %165 : vector<16x16xi1>, vector<16x16xf32>
    %cst_58 = arith.constant dense<0xFF800000> : vector<16xf32>
    %167 = vector.multi_reduction <maximumf>, %166, %cst_58 [1] : vector<16x16xf32> to vector<16xf32>
    %168 = vector.shape_cast %167 : vector<16xf32> to vector<16x1xf32>
    %169 = vector.broadcast %168 : vector<16x1xf32> to vector<16x16xf32>
    %170 = arith.subf %166, %169 : vector<16x16xf32>
    %171 = math.exp %170 : vector<16x16xf32>
    %cst_59 = arith.constant dense<0.000000e+00> : vector<16xf32>
    %172 = vector.multi_reduction <add>, %171, %cst_59 [1] : vector<16x16xf32> to vector<16xf32>
    %173 = vector.shape_cast %172 : vector<16xf32> to vector<16x1xf32>
    %174 = tpu.reciprocal %173 {approx = true} : vector<16x1xf32> -> vector<16x1xf32>
    %175 = arith.truncf %171 : vector<16x16xf32> to vector<16x16xbf16>
    %cst_60 = arith.constant dense<0.000000e+00> : vector<16x16xf32>
    %176 = tpu.matmul %175, %150, %cst_60 {dimension_numbers = #tpu.dot_dimension_numbers<[1], [0], [0], [1], [0, 0, 1, 1], [], []>} : vector<16x16xbf16>, vector<16x16xbf16>, vector<16x16xf32> -> vector<16x16xf32>
    %177 = vector.broadcast %174 : vector<16x1xf32> to vector<16x16xf32>
    %178 = arith.mulf %176, %177 : vector<16x16xf32>
    %cst_61 = arith.constant 0.000000e+00 : f32
    %179 = vector.broadcast %cst_61 : f32 to vector<16x16xf32>
    %180 = arith.cmpf ogt, %178, %179 : vector<16x16xf32>
    %cst_62 = arith.constant 0.000000e+00 : f32
    %181 = vector.broadcast %cst_62 : f32 to vector<16x16xf32>
    %182 = arith.minimumf %178, %181 : vector<16x16xf32>
    %183 = math.exp %182 : vector<16x16xf32>
    %cst_63 = arith.constant 1.000000e+00 : f32
    %184 = vector.broadcast %cst_63 : f32 to vector<16x16xf32>
    %185 = arith.subf %183, %184 : vector<16x16xf32>
    %186 = arith.select %180, %178, %185 : vector<16x16xi1>, vector<16x16xf32>
    %c1_i32 = arith.constant 1 : i32
    %187 = arith.cmpi slt, %arg0, %c1_i32 : i32
    %188 = arith.extui %187 : i1 to i32
    %c0_i32 = arith.constant 0 : i32
    %189 = arith.cmpi ne, %188, %c0_i32 : i32
    scf.if %189 {
      %c0_66 = arith.constant 0 : index
      %c0_67 = arith.constant 0 : index
      %193 = vector.load %arg11[%c0_66, %c0_67] : memref<16x16xf32, #tpu.memory_space<vmem>>, vector<16x16xf32>
      tpu.vector_store %arg11[%c0_66, %c0_67], %186 {strides = array<i32>} : memref<16x16xf32, #tpu.memory_space<vmem>>, vector<16x16xf32>,
    } else {
    }
    %c1_i32_64 = arith.constant 1 : i32
    %190 = arith.cmpi eq, %arg0, %c1_i32_64 : i32
    %191 = arith.extui %190 : i1 to i32
    %c0_i32_65 = arith.constant 0 : i32
    %192 = arith.cmpi ne, %191, %c0_i32_65 : i32
    scf.if %192 {
      %c0_66 = arith.constant 0 : index
      %c0_67 = arith.constant 0 : index
      %193 = vector.load %arg11[%c0_66, %c0_67] : memref<16x16xf32, #tpu.memory_space<vmem>>, vector<16x16xf32>
      %c0_68 = arith.constant 0 : index
      %c0_69 = arith.constant 0 : index
      %194 = vector.load %arg7[%c0_68, %c0_69] : memref<16x16xbf16, #tpu.memory_space<vmem>>, vector<16x16xbf16>
      %c0_70 = arith.constant 0 : index
      %c0_71 = arith.constant 0 : index
      %195 = vector.load %arg8[%c0_70, %c0_71] : memref<1x16xf32, #tpu.memory_space<vmem>>, vector<1x16xf32>
      %c0_72 = arith.constant 0 : index
      %c0_73 = arith.constant 0 : index
      %196 = vector.load %arg9[%c0_72, %c0_73] : memref<16x1xbf16, #tpu.memory_space<vmem>>, vector<16x1xbf16>
      %197 = arith.truncf %193 : vector<16x16xf32> to vector<16x16xbf16>
      %cst_74 = arith.constant dense<0.000000e+00> : vector<16x16xf32>
      %198 = tpu.matmul %197, %194, %cst_74 {dimension_numbers = #tpu.dot_dimension_numbers<[1], [0], [0], [1], [0, 0, 1, 1], [], []>} : vector<16x16xbf16>, vector<16x16xbf16>, vector<16x16xf32> -> vector<16x16xf32>
      %199 = vector.broadcast %195 : vector<1x16xf32> to vector<16x16xf32>
      %200 = arith.addf %198, %199 : vector<16x16xf32>
      %201 = math.tanh %200 : vector<16x16xf32>
      %202 = arith.truncf %186 : vector<16x16xf32> to vector<16x16xbf16>
      %cst_75 = arith.constant dense<0.000000e+00> : vector<16x16xf32>
      %203 = tpu.matmul %202, %194, %cst_75 {dimension_numbers = #tpu.dot_dimension_numbers<[1], [0], [0], [1], [0, 0, 1, 1], [], []>} : vector<16x16xbf16>, vector<16x16xbf16>, vector<16x16xf32> -> vector<16x16xf32>
      %204 = vector.broadcast %195 : vector<1x16xf32> to vector<16x16xf32>
      %205 = arith.addf %203, %204 : vector<16x16xf32>
      %206 = math.tanh %205 : vector<16x16xf32>
      %207 = arith.truncf %201 : vector<16x16xf32> to vector<16x16xbf16>
      %cst_76 = arith.constant dense<0.000000e+00> : vector<16x1xf32>
      %208 = tpu.matmul %207, %196, %cst_76 {dimension_numbers = #tpu.dot_dimension_numbers<[1], [0], [0], [1], [0, 0, 1, 1], [], []>} : vector<16x16xbf16>, vector<16x1xbf16>, vector<16x1xf32> -> vector<16x1xf32>
      %209 = arith.truncf %206 : vector<16x16xf32> to vector<16x16xbf16>
      %cst_77 = arith.constant dense<0.000000e+00> : vector<16x1xf32>
      %210 = tpu.matmul %209, %196, %cst_77 {dimension_numbers = #tpu.dot_dimension_numbers<[1], [0], [0], [1], [0, 0, 1, 1], [], []>} : vector<16x16xbf16>, vector<16x1xbf16>, vector<16x1xf32> -> vector<16x1xf32>
      %211 = arith.maximumf %208, %210 : vector<16x1xf32>
      %212 = arith.subf %208, %211 : vector<16x1xf32>
      %213 = math.exp %212 : vector<16x1xf32>
      %214 = arith.subf %210, %211 : vector<16x1xf32>
      %215 = math.exp %214 : vector<16x1xf32>
      %216 = arith.addf %213, %215 : vector<16x1xf32>
      %217 = tpu.reciprocal %216 {approx = true} : vector<16x1xf32> -> vector<16x1xf32>
      %218 = arith.mulf %213, %217 : vector<16x1xf32>
      %219 = vector.broadcast %218 : vector<16x1xf32> to vector<16x16xf32>
      %220 = arith.mulf %219, %193 : vector<16x16xf32>
      %221 = arith.mulf %215, %217 : vector<16x1xf32>
      %222 = vector.broadcast %221 : vector<16x1xf32> to vector<16x16xf32>
      %223 = arith.mulf %222, %186 : vector<16x16xf32>
      %224 = arith.addf %220, %223 : vector<16x16xf32>
      %c0_78 = arith.constant 0 : index
      %c0_79 = arith.constant 0 : index
      %225 = vector.load %arg10[%c0_78, %c0_79] : memref<16x16xf32, #tpu.memory_space<vmem>>, vector<16x16xf32>
      tpu.vector_store %arg10[%c0_78, %c0_79], %224 {strides = array<i32>} : memref<16x16xf32, #tpu.memory_space<vmem>>, vector<16x16xf32>,
    } else {
    }
    return
  }
  func.func @transform_0(%arg0: i32) -> (i32, i32) {
    %c0_i32 = arith.constant 0 : i32
    %c0_i32_0 = arith.constant 0 : i32
    %c0_i32_1 = arith.constant 0 : i32
    return %c0_i32, %c0_i32_0 : i32, i32
  }
  func.func @transform_1(%arg0: i32) -> (i32, i32, i32) {
    %c0_i32 = arith.constant 0 : i32
    %c0_i32_0 = arith.constant 0 : i32
    %c0_i32_1 = arith.constant 0 : i32
    return %arg0, %c0_i32, %c0_i32_0 : i32, i32, i32
  }
  func.func @transform_2(%arg0: i32) -> (i32, i32, i32) {
    %c0_i32 = arith.constant 0 : i32
    %c0_i32_0 = arith.constant 0 : i32
    %c0_i32_1 = arith.constant 0 : i32
    return %arg0, %c0_i32, %c0_i32_0 : i32, i32, i32
  }
  func.func @transform_3(%arg0: i32) -> (i32, i32, i32) {
    %c0_i32 = arith.constant 0 : i32
    %c0_i32_0 = arith.constant 0 : i32
    %c0_i32_1 = arith.constant 0 : i32
    return %arg0, %c0_i32, %c0_i32_0 : i32, i32, i32
  }
  func.func @transform_4(%arg0: i32) -> (i32, i32, i32) {
    %c0_i32 = arith.constant 0 : i32
    %c0_i32_0 = arith.constant 0 : i32
    %c0_i32_1 = arith.constant 0 : i32
    return %arg0, %c0_i32, %c0_i32_0 : i32, i32, i32
  }
  func.func @transform_5(%arg0: i32) -> (i32, i32, i32) {
    %c0_i32 = arith.constant 0 : i32
    %c0_i32_0 = arith.constant 0 : i32
    %c0_i32_1 = arith.constant 0 : i32
    return %arg0, %c0_i32, %c0_i32_0 : i32, i32, i32
  }
  func.func @transform_6(%arg0: i32) -> (i32, i32) {
    %c0_i32 = arith.constant 0 : i32
    %c0_i32_0 = arith.constant 0 : i32
    %c0_i32_1 = arith.constant 0 : i32
    return %c0_i32, %c0_i32_0 : i32, i32
  }
  func.func @transform_7(%arg0: i32) -> (i32, i32) {
    %c0_i32 = arith.constant 0 : i32
    %c0_i32_0 = arith.constant 0 : i32
    %c0_i32_1 = arith.constant 0 : i32
    return %c0_i32, %c0_i32_0 : i32, i32
  }
  func.func @transform_8(%arg0: i32) -> (i32, i32) {
    %c0_i32 = arith.constant 0 : i32
    %c0_i32_0 = arith.constant 0 : i32
    %c0_i32_1 = arith.constant 0 : i32
    return %c0_i32, %c0_i32_0 : i32, i32
  }
  func.func @transform_9(%arg0: i32) -> (i32, i32) {
    %c0_i32 = arith.constant 0 : i32
    %c0_i32_0 = arith.constant 0 : i32
    %c0_i32_1 = arith.constant 0 : i32
    return %c0_i32, %c0_i32_0 : i32, i32
  }
}

</mosaic_0001>

<bundles_post_ra>
// kernel: tpu_custom_call.1
= control target key start
LH: loop header
LB: loop body
LE: loop exit
PB: predicated region body
PF: predicated region fallthrough
CT: control target
= control target key end

     0   :  { %14 = vsyncpa [#allocation4], 0  ;;  %s2037_s30 = smov 0   ;;  %s2265_s0 = inlined_call_operand.vmem [shape: bf16[16,8], index: 0, kind: input, shape index: {}]   ;;  %s2266_s1 = inlined_call_operand.vmem [shape: s8[2,16,16], index: 1, kind: input, shape index: {}]   ;;  %s2267_s2 = inlined_call_operand.vmem [shape: bf16[2,8,32], index: 2, kind: input, shape index: {}]   ;;  %s2268_s3 = inlined_call_operand.vmem [shape: bf16[2,32,8], index: 3, kind: input, shape index: {}]   ;;  %s2269_s4 = inlined_call_operand.vmem [shape: bf16[2,32,16], index: 4, kind: input, shape index: {}]   ;;  %s2270_s5 = inlined_call_operand.vmem [shape: bf16[2,16,2], index: 5, kind: input, shape index: {}]   ;;  %s2271_s6 = inlined_call_operand.vmem [shape: bf16[16,16], index: 6, kind: input, shape index: {}]   ;;  %s2272_s7 = inlined_call_operand.vmem [shape: f32[1,16], index: 7, kind: input, shape index: {}]   ;;  %s2273_s8 = inlined_call_operand.vmem [shape: bf16[16,1], index: 8, kind: input, shape index: {}]   ;;  %s2274_s9 = inlined_call_operand.hbm [shape: f32[16,16], index: 9, kind: output, shape index: {}]  }
   0x1 LB: > { %s2043_s10 = sadd.s32 4294967295, %s1968_s30   ;;  %p1625_p0 = scmp.ge.s32.totalorder %s1968_s30, 1  ;;  %s1968_s30 = sphi %s2037_s30, %s20_s30  }
   0x2   : > { %p322_p1 = scmp.lt.s32.totalorder %s1968_s30, 3 }
   0x4   : > { %p323_p2 = pnand %p1625_p0, %p322_p1 }
   0x5   : > { %p372_p3 = scmp.lt.s32.totalorder (!%p323_p2), %s2043_s10, 1  ;;  %v1970_v0 = vmov (!%p323_p2), 0.0   ;;  %vm1971_vm0 = vmmov (!%p323_p2), 0   ;;  %vm415_vm1 = vcmask (!%p323_p2), 1043456   ;;  %v1842_v2 = vld [vmem:[%s2265_s0] sm:$0xff] (!%p323_p2)   ;;  %vm411_vm2 = vcmask (!%p323_p2), 64512  }
   0x6   : > { %326 = sbr.rel (%p323_p2) target bundleno = 2842 (0xb1a), region = 56  ;;  %1705 = vmatprep.subr.bf16.mxu0 (!%p323_p2), %v1970_v0  ;;  %1707 = vmatprep.mubr.msk.bf16.mxu0 (!%p323_p2), %vm1971_vm0, %v1970_v0  ;;  %v1972_v6 = vmov (!%p323_p2), 2   ;;  %v1973_v7 = vmov (!%p323_p2), 0   ;;  %vm477_vm3 = vcmask (!%p323_p2), 261120   ;;  %v1974_v17 = vmov (!%p323_p2), 6   ;;  %s1976_s25 = smov (!%p323_p2), 120  }
   0x7   : > { %1711 = vmatprep.subr.bf16.mxu1 (!%p323_p2), %v1970_v0  ;;  %1715 = vmatprep.mubr.msk.bf16.mxu1 (!%p323_p2), %vm1971_vm0, %v1970_v0  ;;  %v1975_v18 = vmov (!%p323_p2), 4   ;;  %v564_v26 = vlaneseq (!%p323_p2)  ;;  %vm584_vm10 = vcmask (!%p323_p2), 130048   ;;  %s1977_s29 = smov (!%p323_p2), 112   ;;  %s1980_s18 = smov (!%p323_p2), 16  }
   0x8   : > { %1819 = vset.pattern.permute.xlu1 (!%p323_p2), %v1972_v6  ;;  %1818 = vset.pattern.permute.xlu0 (!%p323_p2), %v1973_v7  ;;  %s1981_s19 = smov (!%p323_p2), 24   ;;  %p1660_p4 = scmp.ge.s32.totalorder (!%p323_p2), %s2043_s10, 1 }
   0x9   : > { %v2098_v30 = vshrl.u32 (!%p323_p2), %v564_v26, 7 }
   0xb   : > { %v566_v32 = vsub.s32 (!%p323_p2), 1, %v2098_v30  ;;  %v674_v33 = vsub.s32 (!%p323_p2), 3, %v2098_v30  ;;  %v779_v34 = vsub.s32 (!%p323_p2), 5, %v2098_v30  ;;  %v883_v37 = vsub.s32 (!%p323_p2), 7, %v2098_v30 }
   0xd   : > { %s2052_s11 = scalar_select %p372_p3, %s2043_s10, 1 }
   0xf   : > { %s1673_s12 = sshll.u32 %s2052_s11, 2  ;;  %s1674_s13 = sshll.u32 %s2052_s11, 4 }
  0x10   : > { %s380_s16 = scalar_lea.vmem %s2267_s2, %s1673_s12  ;;  %s385_s21 = scalar_lea.vmem %s2268_s3, %s1674_s13 }
  0x11   : > { %v405_v1 = vld [vmem:[%s380_s16] sm:$0xf]  ;;  %s2073_s24 = scalar_lea.vmem %s2269_s4, %s1674_s13  ;;  %v1844_v5 = vld [vmem:[%s385_s21 + $0x8] sm:$0xff]   ;;  %s376_s28 = scalar_lea.vmem %s2266_s1, %s1673_s12 }
  0x12   : > { %v417_v3 = vsel %vm415_vm1, %v405_v1, 0  ;;  %v1843_v4 = vld [vmem:[%s385_s21] sm:$0xff]   ;;  %s1978_s12 = smov 104   ;;  %s1979_s13 = smov 8  }
  0x13   : > { %1706 = vmatpush3.bf16.msra.mxu0 %v417_v3  ;;  %1712 = vmatpush3.bf16.msra.mxu1 %v1843_v4  ;;  %v401_v28 = vld [vmem:[%s376_s28] sm:$0x3]  ;;  %v402_v29 = vld [vmem:[%s376_s28 + $0x2] sm:$0x3]  ;;  %s1676_s14 = sshll.u32 %s2052_s11, 3 }
  0x14   : > { %1719 = vmatprep.subr.bf16.mxu0 %v1970_v0  ;;  %1713 = vmatprep.subr.bf16.mxu1 %v1970_v0  ;;  %vm403_vm4 = vnez %v401_v28  ;;  %vm404_vm5 = vnez %v402_v29  ;;  %s395_s17 = scalar_lea.vmem %s2270_s5, %s1676_s14 }
  0x15   : > { %v577_v35 = vsel %vm404_vm5, 16843009, %v1973_v7  ;;  %v576_v36 = vsel %vm403_vm4, 16843009, %v1973_v7 }
  0x16   : > { %1708 = vmatmul.mubr.msk.bf16.vlgmr.msra.gmra.mrb[0].mxu0 %vm411_vm2, %v1842_v2  ;;  %v579_v39 = vunpack.c.0.s8 %v577_v35  ;;  %v578_v40 = vunpack.c.0.s8 %v576_v36 }
  0x17   : > { %1721 = vmatprep.mubr.msk.bf16.mxu0 %vm1971_vm0, %v1970_v0  ;;  %1714 = vmatpush3.bf16.msra.mxu1 %v1844_v5 }
  0x18   : > { %1725 = vmatprep.subr.bf16.mxu1 %v1970_v0  ;;  %vm2106_vm6 = vcmp.ne.s32.totalorder %v579_v39, 0  ;;  %vm2110_vm7 = vcmp.ne.s32.totalorder %v578_v40, 0 }
  0xe9   : > { %v453_v8 = vpop.f32.mrb[0].mxu0 }
  0xea   : > { %v1709_v9 = vpop.f32.mrb[1].mxu0 }
  0xeb   : > { %v456_v10 = vpop.f32.mrb[2].mxu0 }
  0xec   : > { %v2081_v11 = vpack.c.bf16 %v456_v10, %v453_v8  ;;  %v1710_v12 = vpop.f32.mrb[3].mxu0 }
  0xee   : > { %1716 = vmatmul.mubr.msk.bf16.vlgmr.msra.gmra.mrb[0].mxu1 %vm477_vm3, %v2081_v11  ;;  %1720 = vmatpush3.bf16.msra.mxu0 %v2081_v11 }
  0xef   : > { %1727 = vmatprep.mubr.msk.bf16.mxu1 %vm1971_vm0, %v1970_v0  ;;  %1731 = vmatprep.subr.bf16.mxu0 %v1970_v0 }
 0x1c1   : > { %v515_v13 = vpop.f32.mrb[0].mxu1 }
 0x1c2   : > { %665 = vperm.xlu1 %1819, %v515_v13   ;;  %556 = vperm.xlu0 %1818, %v515_v13   ;;  %v1717_v14 = vpop.f32.mrb[1].mxu1 }
 0x1c3   : > { %v518_v15 = vpop.f32.mrb[2].mxu1 }
 0x1c4   : > { %v1718_v16 = vpop.f32.mrb[3].mxu1 }
 0x1c6   : > { %1821 = vset.pattern.permute.xlu1 %v1974_v17  ;;  %561 = vperm.xlu0 %1818, %v518_v15  }
 0x1c7   : > { %874 = vperm.xlu1 %1821, %v515_v13  }
 0x1ca   : > { %1820 = vset.pattern.permute.xlu0 %v1975_v18 }
 0x1cb   : > { %1822 = vset.pattern.permute.xlu1 %v1972_v6  ;;  %770 = vperm.xlu0 %1820, %v515_v13  }
 0x1cc   : > { %669 = vperm.xlu1 %1822, %v518_v15  }
 0x1cf   : > { %1824 = vset.pattern.permute.xlu0 %v1974_v17 }
 0x1d0   : > { %1823 = vset.pattern.permute.xlu1 %v1975_v18  ;;  %878 = vperm.xlu0 %1824, %v518_v15  }
 0x1d1   : > { %774 = vperm.xlu1 %1823, %v518_v15  }
 0x1d4   : > { %708 = vrot.lane.b32.xlu0 %v2081_v11, %s1976_s25 }
 0x1d5   : > { %1840 = vset.pattern.permute.xlu0 %v1973_v7 }
 0x1fa   : > { %522 = vxpose.xlu1.b32.start [1/2] (short) (narrow) %v515_v13, 8 }
 0x1fe   : > { %523 = vxpose.xlu1.b32.end [2/2] (short) (narrow) %v518_v15, 8 }
 0x21c   : > { %1841 = vset.pattern.permute.xlu1 %v1973_v7 }
 0x241   : > { %v557_v19 = vpop.permute.xlu0 %556  ;;  %v666_v24 = vpop.permute.xlu1 %665 }
 0x245   : > { %v562_v20 = vpop.permute.xlu0 %561 }
 0x246   : > { %v875_v25 = vpop.permute.xlu1 %874 }
 0x24a   : > { %v771_v21 = vpop.permute.xlu0 %770 }
 0x24b   : > { %v670_v27 = vpop.permute.xlu1 %669 }
 0x24f   : > { %v2090_v22 = vpop.permute.xlu0 %878 }
 0x250   : > { %v775_v31 = vpop.permute.xlu1 %774 }
 0x253   : > { %v709_v23 = vpop.permute.xlu0 %708 }
 0x254   : > { %1726 = vmatpush3.bf16.msra.mxu1 %v709_v23 }
 0x255   : > { %1737 = vmatprep.subr.bf16.mxu1 %v1970_v0 }
 0x27a   : > { %v538_v38 = vpop.trf.xlu1 }
 0x27b   : > { %v567_v41 = vrot.slane %v538_v38, %v566_v32  ;;  %v675_v42 = vrot.slane %v538_v38, %v674_v33  ;;  %v780_v43 = vrot.slane %v538_v38, %v779_v34  ;;  %v884_v44 = vrot.slane %v538_v38, %v883_v37 }
 0x27d   : > { %v677_v45 = vadd.f32 %v675_v42, %v670_v27  ;;  %v568_v46 = vadd.f32 %v567_v41, %v557_v19  ;;  %v676_v47 = vadd.f32 %v675_v42, %v666_v24  ;;  %v781_v48 = vadd.f32 %v780_v43, %v771_v21 }
 0x27e   : > { %v885_v57 = vadd.f32 %v884_v44, %v875_v25  ;;  %v569_v3 = vadd.f32 %v567_v41, %v562_v20  ;;  %v782_v8 = vadd.f32 %v780_v43, %v775_v31  ;;  %v886_v14 = vadd.f32 %v884_v44, %v2090_v22 }
 0x27f   : > { %vm679_vm8 = vcmp.gt.f32.partialorder %v677_v45, 0.0  ;;  %v681_v51 = vmul.f32 0.2, %v677_v45  ;;  %vm570_vm9 = vcmp.gt.f32.partialorder %v568_v46, 0.0  ;;  %v572_v52 = vmul.f32 0.2, %v568_v46 }
 0x280   : > { %vm678_vm11 = vcmp.gt.f32.partialorder %v676_v47, 0.0  ;;  %v680_v53 = vmul.f32 0.2, %v676_v47  ;;  %v785_v56 = vmul.f32 0.2, %v781_v48  ;;  %vm783_vm12 = vcmp.gt.f32.partialorder %v781_v48, 0.0 }
 0x281   : > { %v683_v54 = vsel %vm679_vm8, %v677_v45, %v681_v51  ;;  %v574_v55 = vsel %vm570_vm9, %v568_v46, %v572_v52  ;;  %v889_v2 = vmul.f32 0.2, %v885_v57  ;;  %vm887_vm13 = vcmp.gt.f32.partialorder %v885_v57, 0.0 }
 0x282   : > { %v685_v58 = vsel %vm2106_vm6, %v683_v54, -9e+15  ;;  %v2118_v59 = vsel %vm2110_vm7, %v574_v55, -9e+15  ;;  %v682_v60 = vsel %vm678_vm11, %v676_v47, %v680_v53  ;;  %v787_v1 = vsel %vm783_vm12, %v781_v48, %v785_v56 }
 0x283   : > { %v689_v61 = vsel %vm584_vm10, %v685_v58, -inf  ;;  %v585_v62 = vsel %vm584_vm10, %v2118_v59, -inf  ;;  %v684_v63 = vsel %vm2110_vm7, %v682_v60, -9e+15  ;;  %v789_v5 = vsel %vm2110_vm7, %v787_v1, -9e+15 }
 0x284   : > { %690 = vmax.xlane.f32.xlu1 %v689_v61  ;;  %586 = vmax.xlane.f32.xlu0 %v585_v62  ;;  %v686_v4 = vsel %vm584_vm10, %v684_v63, -inf  ;;  %v891_v6 = vsel %vm887_vm13, %v885_v57, %v889_v2  ;;  %v573_v7 = vmul.f32 0.2, %v569_v3  ;;  %vm571_vm14 = vcmp.gt.f32.partialorder %v569_v3, 0.0 }
 0x285   : > { %v791_v9 = vsel %vm584_vm10, %v789_v5, -inf  ;;  %v893_v10 = vsel %vm2110_vm7, %v891_v6, -9e+15  ;;  %v786_v13 = vmul.f32 0.2, %v782_v8  ;;  %vm784_vm15 = vcmp.gt.f32.partialorder %v782_v8, 0.0 }
 0x286   : > { %v575_v12 = vsel %vm571_vm14, %v569_v3, %v573_v7  ;;  %v895_v15 = vsel %vm584_vm10, %v893_v10, -inf  ;;  %v890_v18 = vmul.f32 0.2, %v886_v14  ;;  %vm888_vm1 = vcmp.gt.f32.partialorder %v886_v14, 0.0 }
 0x287   : > { %v583_v16 = vsel %vm2106_vm6, %v575_v12, -9e+15  ;;  %v788_v17 = vsel %vm784_vm15, %v782_v8, %v786_v13  ;;  %vm1005_vm15 = vcmask 195584  }
 0x288   : > { %687 = vmax.xlane.f32.xlu0 %v686_v4  ;;  %v588_v19 = vsel %vm584_vm10, %v583_v16, -inf  ;;  %v790_v20 = vsel %vm2106_vm6, %v788_v17, -9e+15  ;;  %v892_v21 = vsel %vm888_vm1, %v886_v14, %v890_v18 }
 0x289   : > { %v794_v22 = vsel %vm584_vm10, %v790_v20, -inf  ;;  %v894_v23 = vsel %vm2106_vm6, %v892_v21, -9e+15 }
 0x28a   : > { %v898_v24 = vsel %vm584_vm10, %v894_v23, -inf }
 0x28c   : > { %792 = vmax.xlane.f32.xlu0 %v791_v9 }
 0x290   : > { %896 = vmax.xlane.f32.xlu0 %v895_v15 }
 0x294   : > { %589 = vmax.xlane.f32.xlu0 %v588_v19 }
 0x295   : > { %812 = vrot.lane.b32.xlu1 %v2081_v11, %s1977_s29 }
 0x298   : > { %795 = vmax.xlane.f32.xlu0 %v794_v22 }
 0x29c   : > { %899 = vmax.xlane.f32.xlu0 %v898_v24 }
 0x2b2   : > { %916 = vrot.lane.b32.xlu0 %v2081_v11, %s1978_s12 }
 0x311   : > { %v691_v25 = vpop.xlane.xlu1 %690  ;;  %v587_v26 = vpop.xlane.xlu0 %586 }
 0x312   : > { %v693_v27 = vsub.f32 %v685_v58, %v691_v25  ;;  %v591_v37 = vsub.f32 %v2118_v59, %v587_v26 }
 0x314   : > { %v696_v28 = vmul.f32 1.442695, %v693_v27  ;;  %v593_v11 = vmul.f32 1.442695, %v591_v37 }
 0x315   : > { %v688_v29 = vpop.xlane.xlu0 %687  ;;  %v813_v3 = vpop.permute.xlu1 %812 }
 0x316   : > { %1848 = vpow2.f32 %v696_v28  ;;  %v692_v31 = vsub.f32 %v684_v63, %v688_v29 }
 0x318   : > { %v694_v33 = vmul.f32 1.442695, %v692_v31 }
 0x319   : > { %v793_v34 = vpop.xlane.xlu0 %792 }
 0x31a   : > { %1850 = vpow2.f32 %v694_v33  ;;  %v797_v35 = vsub.f32 %v789_v5, %v793_v34 }
 0x31c   : > { %v799_v36 = vmul.f32 1.442695, %v797_v35 }
 0x31d   : > { %v897_v38 = vpop.xlane.xlu0 %896 }
 0x31e   : > { %1852 = vpow2.f32 %v799_v36  ;;  %v901_v39 = vsub.f32 %v893_v10, %v897_v38 }
 0x320   : > { %v1849_v40 = vpop.eup %1848  ;;  %v903_v41 = vmul.f32 1.442695, %v901_v39 }
 0x321   : > { %v590_v42 = vpop.xlane.xlu0 %589  ;;  %v701_v43 = vsel %vm584_vm10, %v1849_v40, 0.0 }
 0x322   : > { %1854 = vpow2.f32 %v903_v41  ;;  %v592_v44 = vsub.f32 %v583_v16, %v590_v42  ;;  %702 = vadd.xlane.f32.xlu1 %v701_v43 }
 0x323   : > { %1856 = vpow2.f32 %v593_v11 }
 0x324   : > { %v1851_v45 = vpop.eup %1850  ;;  %v595_v46 = vmul.f32 1.442695, %v592_v44 }
 0x325   : > { %v796_v47 = vpop.xlane.xlu0 %795  ;;  %v698_v48 = vsel %vm584_vm10, %v1851_v45, 0.0  ;;  %v706_v51 = vpack.c.bf16 %v1849_v40, %v1851_v45 }
 0x326   : > { %1858 = vpow2.f32 %v595_v46  ;;  %v798_v52 = vsub.f32 %v790_v20, %v796_v47  ;;  %699 = vadd.xlane.f32.xlu0 %v698_v48 }
 0x327   : > { %1728 = vmatmul.mubr.msk.bf16.vlgmr.msra.gmra.mrb[4].mxu1 %vm584_vm10, %v706_v51 }
 0x328   : > { %v1853_v53 = vpop.eup %1852  ;;  %v801_v54 = vmul.f32 1.442695, %v798_v52  ;;  %1739 = vmatprep.mubr.msk.bf16.mxu1 %vm1971_vm0, %v1970_v0 }
 0x329   : > { %v900_v55 = vpop.xlane.xlu0 %899  ;;  %v803_v56 = vsel %vm584_vm10, %v1853_v53, 0.0 }
 0x32a   : > { %1860 = vpow2.f32 %v801_v54  ;;  %v902_v57 = vsub.f32 %v894_v23, %v900_v55  ;;  %804 = vadd.xlane.f32.xlu0 %v803_v56 }
 0x32c   : > { %v1855_v58 = vpop.eup %1854  ;;  %v905_v59 = vmul.f32 1.442695, %v902_v57 }
 0x32d   : > { %v917_v60 = vpop.permute.xlu0 %916  ;;  %v907_v61 = vsel %vm584_vm10, %v1855_v58, 0.0  ;;  %v1857_v62 = vpop.eup %1856 }
 0x32e   : > { %1862 = vpow2.f32 %v905_v59  ;;  %908 = vadd.xlane.f32.xlu0 %v907_v61  ;;  %1738 = vmatpush3.bf16.msra.mxu1 %v917_v60  ;;  %v597_v10 = vsel %vm584_vm10, %v1857_v62, 0.0 }
 0x32f   : > { %1751 = vmatprep.subr.bf16.mxu1 %v1970_v0 }
 0x330   : > { %v1859_v63 = vpop.eup %1858 }
 0x331   : > { %v600_v1 = vsel %vm584_vm10, %v1859_v63, 0.0  ;;  %v605_v2 = vpack.c.bf16 %v1859_v63, %v1857_v62 }
 0x332   : > { %601 = vadd.xlane.f32.xlu1 %v600_v1 }
 0x333   : > { %1722 = vmatmul.mubr.msk.bf16.vlgmr.msra.gmra.mrb[4].mxu0 %vm584_vm10, %v605_v2 }
 0x334   : > { %v1861_v4 = vpop.eup %1860  ;;  %1732 = vmatpush3.bf16.msra.mxu0 %v813_v3  ;;  %1733 = vmatprep.mubr.msk.bf16.mxu0 %vm1971_vm0, %v1970_v0 }
 0x335   : > { %v806_v5 = vsel %vm584_vm10, %v1861_v4, 0.0  ;;  %1743 = vmatprep.subr.bf16.mxu0 %v1970_v0  ;;  %v811_v8 = vpack.c.bf16 %v1861_v4, %v1853_v53 }
 0x336   : > { %807 = vadd.xlane.f32.xlu0 %v806_v5  ;;  %v1845_v5 = vld [vmem:[%s2073_s24] sm:$0xff]  }
 0x338   : > { %v1863_v6 = vpop.eup %1862 }
 0x339   : > { %v910_v7 = vsel %vm584_vm10, %v1863_v6, 0.0  ;;  %v915_v9 = vpack.c.bf16 %v1863_v6, %v1855_v58 }
 0x33a   : > { %911 = vadd.xlane.f32.xlu0 %v910_v7 }
 0x33b   : > { %1734 = vmatmul.mubr.msk.bf16.vlgmr.msra.gmra.mrb[8].mxu0 %vm584_vm10, %v811_v8  ;;  %1740 = vmatmul.mubr.msk.bf16.vlgmr.msra.gmra.mrb[8].mxu1 %vm584_vm10, %v915_v9 }
 0x33c   : > { %1747 = vmatprep.mubr.msk.bf16.mxu0 %vm1971_vm0, %v1970_v0  ;;  %1753 = vmatprep.mubr.msk.bf16.mxu1 %vm1971_vm0, %v1970_v0 }
 0x33d   : > { %1744 = vmatpush3.bf16.msra.mxu0 %v1845_v5 }
 0x33e   : > { %598 = vadd.xlane.f32.xlu0 %v597_v10  ;;  %1745 = vmatprep.subr.bf16.mxu0 %v1970_v0 }
 0x3af   : > { %v703_v13 = vpop.xlane.xlu1 %702 }
 0x3b3   : > { %v700_v12 = vpop.xlane.xlu0 %699 }
 0x3b4   : > { %1864 = vrcp.f32 %v700_v12  ;;  %v1846_v12 = vld [vmem:[%s2073_s24 + $0x8] sm:$0xff]  }
 0x3b5   : > { %1866 = vrcp.f32 %v703_v13  ;;  %1746 = vmatpush3.bf16.msra.mxu0 %v1846_v12 }
 0x3b6   : > { %1757 = vmatprep.subr.bf16.mxu0 %v1970_v0 }
 0x3b7   : > { %v805_v14 = vpop.xlane.xlu0 %804 }
 0x3bb   : > { %v909_v16 = vpop.xlane.xlu0 %908 }
 0x3be   : > { %v1865_v15 = vpop.eup %1864 }
 0x3bf   : > { %v1867_v20 = vpop.eup %1866 }
 0x3c3   : > { %v808_v25 = vpop.xlane.xlu0 %807 }
 0x3c7   : > { %v912_v29 = vpop.xlane.xlu0 %911 }
 0x3fa   : > { %v748_v17 = vpop.f32.mrb[4].mxu1 }
 0x3fb   : > { %v755_v18 = vmul.f32 %v1865_v15, %v748_v17  ;;  %v1729_v19 = vpop.f32.mrb[5].mxu1 }
 0x3fc   : > { %v751_v21 = vpop.f32.mrb[6].mxu1 }
 0x3fd   : > { %v759_v22 = vmin.f32 %v755_v18, 0.0  ;;  %v756_v23 = vmul.f32 %v1867_v20, %v751_v21  ;;  %v1730_v24 = vpop.f32.mrb[7].mxu1  ;;  %vm757_vm5 = vcmp.gt.f32.partialorder %v755_v18, 0.0  ;;  %v1847_v21 = vld [vmem:[%s395_s17] sm:$0xff]  }
 0x3fe   : > { %1752 = vmatpush3.bf16.msra.mxu1 %v1847_v21  ;;  %v602_v24 = vpop.xlane.xlu1 %601 }
 0x3ff   : > { %v761_v26 = vmul.f32 1.442695, %v759_v22  ;;  %v760_v27 = vmin.f32 %v756_v23, 0.0  ;;  %vm758_vm4 = vcmp.gt.f32.partialorder %v756_v23, 0.0 }
 0x401   : > { %1868 = vpow2.f32 %v761_v26  ;;  %v763_v28 = vmul.f32 1.442695, %v760_v27 }
 0x402   : > { %1870 = vrcp.f32 %v805_v14 }
 0x403   : > { %1872 = vpow2.f32 %v763_v28 }
 0x404   : > { %1874 = vrcp.f32 %v909_v16 }
 0x405   : > { %1876 = vrcp.f32 %v808_v25 }
 0x406   : > { %v2167_v31 = vpop.f32.mrb[4].mxu0  ;;  %1878 = vrcp.f32 %v912_v29 }
 0x407   : > { %v1723_v33 = vpop.f32.mrb[5].mxu0 }
 0x408   : > { %v2169_v34 = vpop.f32.mrb[6].mxu0 }
 0x409   : > { %v1724_v35 = vpop.f32.mrb[7].mxu0 }
 0x40b   : > { %v1869_v36 = vpop.eup %1868 }
 0x40c   : > { %v1871_v37 = vpop.eup %1870  ;;  %v1644_v39 = vadd.f32 -1.0, %v1869_v36 }
 0x40d   : > { %v1873_v38 = vpop.eup %1872 }
 0x40e   : > { %v1875_v40 = vpop.eup %1874  ;;  %v1645_v41 = vadd.f32 -1.0, %v1873_v38  ;;  %v852_v11 = vpop.f32.mrb[8].mxu0  ;;  %v767_v58 = vsel %vm757_vm5, %v755_v18, %v1644_v39 }
 0x40f   : > { %v956_v42 = vpop.f32.mrb[8].mxu1  ;;  %v859_v43 = vmul.f32 %v1871_v37, %v852_v11  ;;  %v1735_v45 = vpop.f32.mrb[9].mxu0 }
 0x410   : > { %v963_v44 = vmul.f32 %v1875_v40, %v956_v42  ;;  %v1741_v46 = vpop.f32.mrb[9].mxu1  ;;  %v1877_v47 = vpop.eup %1876  ;;  %v768_v52 = vsel %vm758_vm4, %v756_v23, %v1645_v41 }
 0x411   : > { %v855_v48 = vpop.f32.mrb[10].mxu0  ;;  %v959_v51 = vpop.f32.mrb[10].mxu1  ;;  %v863_v54 = vmin.f32 %v859_v43, 0.0  ;;  %v1825_v61 = vpack.i.bf16 %v768_v52, %v767_v58  ;;  %vm861_vm8 = vcmp.gt.f32.partialorder %v859_v43, 0.0 }
 0x412   : > { %v1879_v53 = vpop.eup %1878  ;;  %v967_v55 = vmin.f32 %v963_v44, 0.0  ;;  %v1736_v56 = vpop.f32.mrb[11].mxu0  ;;  %v860_v59 = vmul.f32 %v1877_v47, %v855_v48  ;;  %vm965_vm11 = vcmp.gt.f32.partialorder %v963_v44, 0.0 }
 0x413   : > { %v1742_v57 = vpop.f32.mrb[11].mxu1  ;;  %v964_v60 = vmul.f32 %v1879_v53, %v959_v51  ;;  %v865_v62 = vmul.f32 1.442695, %v863_v54  ;;  %1826 = vrot.lane.b32.xlu0 %v1825_v61, %s1979_s13  ;;  %v599_v23 = vpop.xlane.xlu0 %598 }
 0x414   : > { %v969_v63 = vmul.f32 1.442695, %v967_v55  ;;  %v864_v1 = vmin.f32 %v860_v59, 0.0  ;;  %vm862_vm9 = vcmp.gt.f32.partialorder %v860_v59, 0.0 }
 0x415   : > { %v968_v2 = vmin.f32 %v964_v60, 0.0  ;;  %1880 = vpow2.f32 %v865_v62  ;;  %vm966_vm12 = vcmp.gt.f32.partialorder %v964_v60, 0.0 }
 0x416   : > { %1882 = vpow2.f32 %v969_v63  ;;  %v867_v3 = vmul.f32 1.442695, %v864_v1 }
 0x417   : > { %v971_v4 = vmul.f32 1.442695, %v968_v2 }
 0x418   : > { %1884 = vpow2.f32 %v867_v3 }
 0x419   : > { %1886 = vpow2.f32 %v971_v4 }
 0x41a   : > { %1888 = vrcp.f32 %v599_v23 }
 0x41b   : > { %1890 = vrcp.f32 %v602_v24 }
 0x41f   : > { %v1881_v6 = vpop.eup %1880 }
 0x420   : > { %v1883_v7 = vpop.eup %1882  ;;  %v1647_v8 = vadd.f32 -1.0, %v1881_v6 }
 0x421   : > { %v1650_v10 = vadd.f32 -1.0, %v1883_v7 }
 0x422   : > { %v1885_v9 = vpop.eup %1884  ;;  %v871_v16 = vsel %vm861_vm8, %v859_v43, %v1647_v8 }
 0x423   : > { %v1887_v13 = vpop.eup %1886  ;;  %v1648_v14 = vadd.f32 -1.0, %v1885_v9  ;;  %v975_v19 = vsel %vm965_vm11, %v963_v44, %v1650_v10 }
 0x424   : > { %v1651_v15 = vadd.f32 -1.0, %v1887_v13  ;;  %v1889_v25 = vpop.eup %1888 }
 0x425   : > { %v872_v17 = vsel %vm862_vm9, %v860_v59, %v1648_v14  ;;  %v1891_v26 = vpop.eup %1890  ;;  %v650_v27 = vmul.f32 %v1889_v25, %v2167_v31 }
 0x426   : > { %v1830_v18 = vpack.i.bf16 %v872_v17, %v871_v16  ;;  %v976_v20 = vsel %vm966_vm12, %v964_v60, %v1651_v15  ;;  %v651_v28 = vmul.f32 %v1891_v26, %v2169_v34 }
 0x427   : > { %v1835_v22 = vpack.i.bf16 %v976_v20, %v975_v19  ;;  %v654_v29 = vmin.f32 %v650_v27, 0.0  ;;  %vm652_vm13 = vcmp.gt.f32.partialorder %v650_v27, 0.0 }
 0x428   : > { %1831 = vrot.lane.b32.xlu1 %v1830_v18, %s1980_s18  ;;  %v655_v33 = vmin.f32 %v651_v28, 0.0  ;;  %vm653_vm14 = vcmp.gt.f32.partialorder %v651_v28, 0.0 }
 0x429   : > { %v656_v35 = vmul.f32 1.442695, %v654_v29 }
 0x42a   : > { %v658_v36 = vmul.f32 1.442695, %v655_v33 }
 0x42b   : > { %1892 = vpow2.f32 %v656_v35 }
 0x42c   : > { %1836 = vrot.lane.b32.xlu1 %v1835_v22, %s1981_s19  ;;  %1894 = vpow2.f32 %v658_v36 }
 0x435   : > { %v1893_v37 = vpop.eup %1892 }
 0x436   : > { %v1895_v38 = vpop.eup %1894  ;;  %v1641_v40 = vadd.f32 -1.0, %v1893_v37 }
 0x437   : > { %v1642_v41 = vadd.f32 -1.0, %v1895_v38 }
 0x438   : > { %v662_v31 = vsel %vm652_vm13, %v650_v27, %v1641_v40 }
 0x439   : > { %v663_v34 = vsel %vm653_vm14, %v651_v28, %v1642_v41 }
 0x485   : > { %v1827_v39 = vpop.permute.xlu0 %1826 }
 0x486   : > { %v1829_v42 = vunpack.i.h.bf16 %v1827_v39  ;;  %v1828_v43 = vunpack.i.l.bf16 %v1827_v39 }
 0x488   : > { %v1002_v47 = vsel %vm411_vm2, %v663_v34, %v1829_v42  ;;  %v1001_v48 = vsel %vm411_vm2, %v662_v31, %v1828_v43 }
 0x49a   : > { %v1832_v11 = vpop.permute.xlu1 %1831 }
 0x49b   : > { %v1834_v44 = vunpack.i.h.bf16 %v1832_v11  ;;  %v1833_v45 = vunpack.i.l.bf16 %v1832_v11 }
 0x49d   : > { %v1003_v53 = vsel %vm584_vm10, %v1001_v48, %v1833_v45  ;;  %v1004_v54 = vsel %vm584_vm10, %v1002_v47, %v1834_v44 }
 0x49e   : > { %v1837_v46 = vpop.permute.xlu1 %1836 }
 0x49f   : > { %v1839_v51 = vunpack.i.h.bf16 %v1837_v46  ;;  %v1838_v52 = vunpack.i.l.bf16 %v1837_v46 }
 0x4a1   : > { %v1006_v55 = vsel %vm1005_vm15, %v1003_v53, %v1838_v52  ;;  %v1007_v56 = vsel %vm1005_vm15, %v1004_v54, %v1839_v51 }
 0x4a2   : > { %v1008_v57 = vpack.c.bf16 %v1007_v56, %v1006_v55 }
 0x4a4   : > { %1748 = vmatmul.mubr.msk.bf16.vlgmr.msra.gmra.mrb[12].mxu0 %vm477_vm3, %v1008_v57 }
 0x4a5   : > { %1759 = vmatprep.mubr.msk.bf16.mxu0 %vm1971_vm0, %v1970_v0 }
 0x577   : > { %v1062_v58 = vpop.f32.mrb[12].mxu0 }
 0x578   : > { %v1749_v59 = vpop.f32.mrb[13].mxu0 }
 0x579   : > { %v1065_v60 = vpop.f32.mrb[14].mxu0 }
 0x57a   : > { %v1069_v61 = vpack.c.bf16 %v1065_v60, %v1062_v58  ;;  %v1750_v62 = vpop.f32.mrb[15].mxu0 }
 0x57c   : > { %1754 = vmatmul.mubr.msk.bf16.vlgmr.msra.gmra.mrb[12].mxu1 %vm584_vm10, %v1069_v61  ;;  %1758 = vmatpush3.bf16.msra.mxu0 %v1069_v61 }
 0x64f   : > { %v1115_v63 = vpop.f32.mrb[12].mxu1 }
 0x650   : > { %1156 = vperm.xlu0 %1840, %v1115_v63   ;;  %v1755_v1 = vpop.f32.mrb[13].mxu1 }
 0x651   : > { %v1118_v2 = vpop.f32.mrb[14].mxu1 }
 0x652   : > { %1161 = vperm.xlu1 %1841, %v1118_v2   ;;  %v1756_v3 = vpop.f32.mrb[15].mxu1 }
 0x67b   : > { %1122 = vxpose.xlu1.b32.start [1/2] (short) (narrow) %v1115_v63, 8 }
 0x67f   : > { %1123 = vxpose.xlu1.b32.end [2/2] (short) (narrow) %v1118_v2, 8 }
 0x6cf   : > { %v1157_v6 = vpop.permute.xlu0 %1156 }
 0x6d1   : > { %v1162_v4 = vpop.permute.xlu1 %1161 }
 0x6fb   : > { %v1138_v5 = vpop.trf.xlu1 }
 0x6fc   : > { %v1167_v0 = vrot.slane %v1138_v5, %v566_v32 }
 0x6fe   : > { %v1168_v7 = vadd.f32 %v1167_v0, %v1157_v6  ;;  %v1169_v8 = vadd.f32 %v1167_v0, %v1162_v4 }
 0x700   : > { %vm1170_vm0 = vcmp.gt.f32.partialorder %v1168_v7, 0.0  ;;  %v1172_v9 = vmul.f32 0.2, %v1168_v7  ;;  %vm1171_vm2 = vcmp.gt.f32.partialorder %v1169_v8, 0.0  ;;  %v1173_v10 = vmul.f32 0.2, %v1169_v8 }
 0x702   : > { %v1174_v12 = vsel %vm1170_vm0, %v1168_v7, %v1172_v9  ;;  %v1175_v13 = vsel %vm1171_vm2, %v1169_v8, %v1173_v10 }
 0x703   : > { %v1176_v14 = vsel %vm2110_vm7, %v1174_v12, -9e+15  ;;  %v1177_v16 = vsel %vm2106_vm6, %v1175_v13, -9e+15 }
 0x704   : > { %v1178_v15 = vsel %vm584_vm10, %v1176_v14, -inf  ;;  %v1181_v30 = vsel %vm584_vm10, %v1177_v16, -inf }
 0x705   : > { %1179 = vmax.xlane.f32.xlu0 %v1178_v15 }
 0x709   : > { %1182 = vmax.xlane.f32.xlu0 %v1181_v30 }
 0x792   : > { %v1180_v32 = vpop.xlane.xlu0 %1179 }
 0x793   : > { %v1184_v17 = vsub.f32 %v1176_v14, %v1180_v32 }
 0x795   : > { %v1186_v18 = vmul.f32 1.442695, %v1184_v17 }
 0x796   : > { %v1183_v19 = vpop.xlane.xlu0 %1182 }
 0x797   : > { %1896 = vpow2.f32 %v1186_v18  ;;  %v1185_v20 = vsub.f32 %v1177_v16, %v1183_v19 }
 0x799   : > { %v1188_v21 = vmul.f32 1.442695, %v1185_v20 }
 0x79b   : > { %1898 = vpow2.f32 %v1188_v21 }
 0x7a1   : > { %v1897_v22 = vpop.eup %1896 }
 0x7a2   : > { %v1190_v50 = vsel %vm584_vm10, %v1897_v22, 0.0 }
 0x7a3   : > { %1191 = vadd.xlane.f32.xlu0 %v1190_v50 }
 0x7a5   : > { %v1899_v23 = vpop.eup %1898 }
 0x7a6   : > { %v1193_v24 = vsel %vm584_vm10, %v1899_v23, 0.0  ;;  %v1198_v49 = vpack.c.bf16 %v1899_v23, %v1897_v22 }
 0x7a7   : > { %1194 = vadd.xlane.f32.xlu0 %v1193_v24 }
 0x7a8   : > { %1760 = vmatmul.mubr.msk.bf16.vlgmr.msra.gmra.mrb[16].mxu0 %vm584_vm10, %v1198_v49 }
 0x830   : > { %v1192_v25 = vpop.xlane.xlu0 %1191 }
 0x831   : > { %1900 = vrcp.f32 %v1192_v25 }
 0x834   : > { %v1195_v26 = vpop.xlane.xlu0 %1194 }
 0x835   : > { %1902 = vrcp.f32 %v1195_v26 }
 0x83b   : > { %v1901_v27 = vpop.eup %1900 }
 0x83f   : > { %v1903_v35 = vpop.eup %1902 }
 0x87b   : > { %v1236_v28 = vpop.f32.mrb[16].mxu0 }
 0x87c   : > { %v1243_v29 = vmul.f32 %v1901_v27, %v1236_v28  ;;  %v1761_v33 = vpop.f32.mrb[17].mxu0 }
 0x87d   : > { %v1239_v36 = vpop.f32.mrb[18].mxu0 }
 0x87e   : > { %v1247_v37 = vmin.f32 %v1243_v29, 0.0  ;;  %v1244_v38 = vmul.f32 %v1903_v35, %v1239_v36  ;;  %v1762_v39 = vpop.f32.mrb[19].mxu0  ;;  %vm1245_vm3 = vcmp.gt.f32.partialorder %v1243_v29, 0.0 }
 0x880   : > { %v1249_v40 = vmul.f32 1.442695, %v1247_v37  ;;  %v1248_v41 = vmin.f32 %v1244_v38, 0.0  ;;  %vm1246_vm6 = vcmp.gt.f32.partialorder %v1244_v38, 0.0 }
 0x882   : > { %1904 = vpow2.f32 %v1249_v40  ;;  %v1251_v11 = vmul.f32 1.442695, %v1248_v41 }
 0x884   : > { %1906 = vpow2.f32 %v1251_v11 }
 0x88b   : > { %1260 = sbr.rel (%p1660_p4) target bundleno = 2195 (0x893), region = 60 }
 0x88c   : > { %v1905_v42 = vpop.eup %1904 }
 0x88d   : > { %v1658_v43 = vadd.f32 -1.0, %v1905_v42 }
 0x88e   : > { %v1907_v44 = vpop.eup %1906 }
 0x88f   : > { %v2201_v45 = vsel %vm1245_vm3, %v1243_v29, %v1658_v43  ;;  %v1659_v31 = vadd.f32 -1.0, %v1907_v44 }
 0x890   : > { %1261 = vst.msk [vmem:[#allocation2] sm:$0xff] (!%p1660_p4), %vm584_vm10, %v2201_v45 }
 0x891   : > { %v2203_v34 = vsel %vm1246_vm6, %v1244_v38, %v1659_v31 }
 0x892   : > { %1262 = vst.msk [vmem:[#allocation2 + $0x8] sm:$0xff] %vm584_vm10, %v2203_v34 }
 0x893 PF: > { %p1661_p5 = scmp.ne.s32.totalorder %s2043_s10, 1 }
 0x894   : > { %v1910_v46 = vld [vmem:[%s2271_s6] sm:$0xff] (!%p1661_p5)   ;;  %v1982_v47 = vmov (!%p1661_p5), 0.0   ;;  %v1333_v52 = vpack.c.bf16 (!%p1661_p5), %v2203_v34, %v2201_v45  ;;  %vm1983_vm7 = vmmov (!%p1661_p5), 0   ;;  %v1984_v10 = vmov (!%p1661_p5), 0  }
 0x895   : > { %1266 = sbr.rel (%p1661_p5) target bundleno = 2816 (0xb00), region = 64  ;;  %1763 = vmatprep.subr.bf16.mxu0 (!%p1661_p5), %v1982_v47  ;;  %1769 = vmatprep.subr.bf16.mxu1 (!%p1661_p5), %v1982_v47  ;;  %v1911_v54 = vld [vmem:[%s2273_s8] sm:$0xff] (!%p1661_p5)  }
 0x896   : > { %1764 = vmatpush3.bf16.msra.mxu0 (!%p1661_p5), %v1910_v46  ;;  %1770 = vmatpush3.bf16.msra.mxu1 (!%p1661_p5), %v1910_v46  ;;  %v1662_v55 = vld [vmem:[%s2272_s7] ss:$0 sm:$0xff] (!%p1661_p5) }
 0x897   : > { %1765 = vmatprep.mubr.msk.bf16.mxu0 (!%p1661_p5), %vm1983_vm7, %v1982_v47  ;;  %1771 = vmatprep.mubr.msk.bf16.mxu1 (!%p1661_p5), %vm1983_vm7, %v1982_v47 }
 0x898   : > { %v2214_v48 = vld [vmem:[#allocation2] sm:$0xff] (!%p1661_p5)  ;;  %1775 = vmatprep.subr.bf16.mxu0 (!%p1661_p5), %v1982_v47  ;;  %1781 = vmatprep.subr.bf16.mxu1 (!%p1661_p5), %v1982_v47 }
 0x899   : > { %v2216_v51 = vld [vmem:[#allocation2 + $0x8] sm:$0xff] (!%p1661_p5)  ;;  %1772 = vmatmul.mubr.msk.bf16.vlgmr.msra.gmra.mrb[0].mxu1 (!%p1661_p5), %vm584_vm10, %v1333_v52  ;;  %1909 = vset.pattern.permute.xlu1 (!%p1661_p5), %v1984_v10 }
 0x89a   : > { %v1274_v53 = vpack.c.bf16 (!%p1661_p5), %v2216_v51, %v2214_v48  ;;  %1783 = vmatprep.mubr.msk.bf16.mxu1 (!%p1661_p5), %vm1983_vm7, %v1982_v47  ;;  %1782 = vmatpush3.bf16.msra.mxu1 (!%p1661_p5), %v1911_v54 }
 0x89b   : > { %1908 = vset.pattern.permute.xlu0 (!%p1661_p5), %v1984_v10 }
 0x89c   : > { %1766 = vmatmul.mubr.msk.bf16.vlgmr.msra.gmra.mrb[0].mxu0 %vm584_vm10, %v1274_v53 }
 0x89d   : > { %1777 = vmatprep.mubr.msk.bf16.mxu0 %vm1983_vm7, %v1982_v47  ;;  %1776 = vmatpush3.bf16.msra.mxu0 %v1911_v54 }
 0x96c   : > { %v1371_v57 = vpop.f32.mrb[0].mxu1 }
 0x96d   : > { %v1372_v59 = vadd.f32 %v1662_v55, %v1371_v57  ;;  %v1773_v61 = vpop.f32.mrb[1].mxu1 }
 0x96e   : > { %v1374_v63 = vpop.f32.mrb[2].mxu1 }
 0x96f   : > { %v1324_v56 = vpop.f32.mrb[0].mxu0  ;;  %v1375_v2 = vadd.f32 %v1662_v55, %v1374_v63  ;;  %v1774_v4 = vpop.f32.mrb[3].mxu1 }
 0x970   : > { %v1325_v58 = vadd.f32 %v1662_v55, %v1324_v56  ;;  %v1767_v60 = vpop.f32.mrb[1].mxu0 }
 0x971   : > { %v1327_v62 = vpop.f32.mrb[2].mxu0 }
 0x972   : > { %1912 = vtanh.f32 %v1325_v58  ;;  %v1328_v1 = vadd.f32 %v1662_v55, %v1327_v62  ;;  %v1768_v3 = vpop.f32.mrb[3].mxu0 }
 0x973   : > { %1914 = vtanh.f32 %v1372_v59 }
 0x974   : > { %1916 = vtanh.f32 %v1328_v1 }
 0x975   : > { %1918 = vtanh.f32 %v1375_v2 }
 0x97c   : > { %v1913_v5 = vpop.eup %1912 }
 0x97d   : > { %v1915_v0 = vpop.eup %1914 }
 0x97e   : > { %v1917_v6 = vpop.eup %1916 }
 0x97f   : > { %v1919_v7 = vpop.eup %1918  ;;  %v1380_v8 = vpack.c.bf16 %v1917_v6, %v1913_v5 }
 0x980   : > { %v1431_v9 = vpack.c.bf16 %v1919_v7, %v1915_v0 }
 0x981   : > { %1778 = vmatmul.mubr.msk.bf16.vlgmr.msra.gmra.mrb[4].mxu0 %vm584_vm10, %v1380_v8 }
 0x982   : > { %1784 = vmatmul.mubr.msk.bf16.vlgmr.msra.gmra.mrb[4].mxu1 %vm584_vm10, %v1431_v9 }
 0xa54   : > { %v1424_v12 = vpop.f32.mrb[4].mxu0 }
 0xa55   : > { %v1469_v13 = vpop.f32.mrb[4].mxu1  ;;  %v1779_v14 = vpop.f32.mrb[5].mxu0 }
 0xa56   : > { %v1476_v15 = vmax.f32 %v1424_v12, %v1469_v13  ;;  %v1785_v16 = vpop.f32.mrb[5].mxu1  ;;  %v1427_v30 = vpop.f32.mrb[6].mxu0 }
 0xa57   : > { %v1472_v32 = vpop.f32.mrb[6].mxu1  ;;  %v1780_v17 = vpop.f32.mrb[7].mxu0 }
 0xa58   : > { %v1478_v18 = vsub.f32 %v1424_v12, %v1476_v15  ;;  %v1484_v19 = vsub.f32 %v1469_v13, %v1476_v15  ;;  %v1477_v20 = vmax.f32 %v1427_v30, %v1472_v32  ;;  %v1786_v21 = vpop.f32.mrb[7].mxu1 }
 0xa5a   : > { %v1480_v22 = vmul.f32 1.442695, %v1478_v18  ;;  %v1486_v50 = vmul.f32 1.442695, %v1484_v19  ;;  %v1479_v23 = vsub.f32 %v1427_v30, %v1477_v20  ;;  %v1485_v24 = vsub.f32 %v1472_v32, %v1477_v20 }
 0xa5c   : > { %1920 = vpow2.f32 %v1480_v22  ;;  %v1482_v49 = vmul.f32 1.442695, %v1479_v23  ;;  %v1488_v25 = vmul.f32 1.442695, %v1485_v24 }
 0xa5d   : > { %1922 = vpow2.f32 %v1486_v50 }
 0xa5e   : > { %1924 = vpow2.f32 %v1482_v49 }
 0xa5f   : > { %1926 = vpow2.f32 %v1488_v25 }
 0xa66   : > { %v1921_v26 = vpop.eup %1920 }
 0xa67   : > { %v1923_v27 = vpop.eup %1922 }
 0xa68   : > { %v1925_v28 = vpop.eup %1924  ;;  %v1490_v29 = vadd.f32 %v1923_v27, %v1921_v26 }
 0xa69   : > { %v1927_v33 = vpop.eup %1926 }
 0xa6a   : > { %v1491_v35 = vadd.f32 %v1927_v33, %v1925_v28  ;;  %1928 = vrcp.f32 %v1490_v29 }
 0xa6c   : > { %1930 = vrcp.f32 %v1491_v35 }
 0xa74   : > { %v1929_v36 = vpop.eup %1928 }
 0xa75   : > { %v1508_v37 = vmul.f32 %v1929_v36, %v1923_v27  ;;  %v1494_v38 = vmul.f32 %v1929_v36, %v1921_v26 }
 0xa76   : > { %v1931_v39 = vpop.eup %1930 }
 0xa77   : > { %1512 = vperm.xlu1 %1909, %v1508_v37   ;;  %1498 = vperm.xlu0 %1908, %v1494_v38   ;;  %v1509_v40 = vmul.f32 %v1931_v39, %v1927_v33  ;;  %v1495_v41 = vmul.f32 %v1931_v39, %v1925_v28 }
 0xa7b   : > { %1517 = vperm.xlu1 %1909, %v1509_v40   ;;  %1503 = vperm.xlu0 %1908, %v1495_v41  }
 0xaf6   : > { %v1513_v11 = vpop.permute.xlu1 %1512  ;;  %v1499_v42 = vpop.permute.xlu0 %1498 }
 0xaf7   : > { %v1520_v43 = vmul.f32 %v1513_v11, %v2201_v45  ;;  %v1506_v44 = vmul.f32 %v1499_v42, %v2214_v48 }
 0xaf9   : > { %v1522_v31 = vadd.f32 %v1520_v43, %v1506_v44 }
 0xafa   : > { %v1518_v46 = vpop.permute.xlu1 %1517  ;;  %v1504_v47 = vpop.permute.xlu0 %1503 }
 0xafb   : > { %1524 = vst.msk [vmem:[#allocation3] sm:$0xff] %vm584_vm10, %v1522_v31  ;;  %v1521_v52 = vmul.f32 %v1518_v46, %v2203_v34  ;;  %v1507_v53 = vmul.f32 %v1504_v47, %v2216_v51 }
 0xafd   : > { %v1523_v54 = vadd.f32 %v1521_v52, %v1507_v53 }
 0xaff   : > { %1525 = vst.msk [vmem:[#allocation3 + $0x8] sm:$0xff] %vm584_vm10, %v1523_v54 }
 0xb00 PF: > { %p1791_p6 = scmp.eq.s32.totalorder %s2043_s10, 1  ;;  %s1985_s25 = smov [#allocation3]  }
 0xb01   : > { %s1532_s26 = sshll.u32 %s1985_s25, 4  ;;  %s1533_s26 = int_to_ptr.vmem [resolvable:$true] %s1532_s26 }
 0xb02   : > { %s1932_s27 = scalar_lea.vmem %s1533_s26, 256  ;;  %p1939_p10 = scmp.lt.s32.totalorder %s1533_s26, %s1533_s26 }
 0xb03   : > { %p1933_p7 = scmp.ne.s32.totalorder %s1533_s26, %s1932_s27  ;;  %p1940_p11 = scmp.lt.s32.totalorder %s1932_s27, %s1932_s27 }
 0xb05   : > { %p1934_p8 = pnand %p1933_p7, %p1791_p6  ;;  %p1941_p12 = por %p1940_p11, %p1939_p10 }
 0xb07   : > { %p1935_p9 = pneg %p1934_p8 }
 0xb09   : > { %p1942_p13 = pnand %p1941_p12, %p1935_p9 }
 0xb0b   : > { %1945 = shalt.err (!%p1942_p13)
}
 0xb0c   : > { %s1946_s12 = scalar_lea.hbm %s2274_s9, 256 }
 0xb0d   : > { %p1947_p0 = scmp.ne.s32.totalorder %s2274_s9, %s1946_s12  ;;  %p1952_p3 = scmp.lt.u32.totalorder %s1946_s12, %s2274_s9 }
 0xb0f   : > { %p1948_p1 = pnand %p1947_p0, %p1791_p6 }
 0xb11   : > { %p1949_p2 = pneg %p1948_p1 }
 0xb13   : > { %p1954_p4 = pnand %p1952_p3, %p1949_p2 }
 0xb15   : > { %1957 = shalt.err (!%p1954_p4)
}
 0xb16   : > { %s1986_s18 = smov 128  }
 0xb17   : > { %1788 = dma.vmem_to_hbm [thread:$0]  (%p1791_p6), %s1533_s26, 256, %s2274_s9, [#allocation4], %s1986_s18, %s1986_s18, %s1979_s13  }
 0xb18   : > { %1963 = dma.done.wait (%p1791_p6), [#allocation4], 256  }
 0xb19   : > { %1965 = vsyncadd (%p1791_p6), [#allocation4], 4294967040 }
 0xb1a PF: > { %s20_s30 = sadd.s32 1, %s1968_s30  }
 0xb1b   : > { %p17_p5 = scmp.ge.s32.totalorder %s20_s30, 4  }
 0xb1d   :  { %19 = sbr.rel (!%p17_p5) target bundleno = 1 (0x1), region = 103 }
 0xb24   :  { %1548 = vsyncpa [#allocation4], 1 }
 0xb25   :  { %1550 = vsyncpa [#allocation4 + $0x1], 1 }

</bundles_post_ra>
